<compile_context>
chip_gen: v7x
topology: tpu7x:2x2x1
jax: 0.10.0
libtpu: 0.0.40
codegen_flags: <defaults>
</compile_context>

<pallas_src>
import functools

import jax
import jax.numpy as jnp
import numpy as np
from jax import lax
from jax.experimental import pallas as pl
from jax.experimental.pallas import tpu as pltpu

LN_EPS = 1e-5
_INV_SQRT2 = float(1.0 / np.sqrt(2.0))
_SQRT_2_OVER_PI = 0.7978845608028654


# --------------------------------------------------------------------------
# shared math helpers
# --------------------------------------------------------------------------


def _layernorm(x, gamma, beta):
    """LayerNorm over the last axis (biased variance, matches torch)."""
    mean = jnp.mean(x, axis=-1, keepdims=True)
    var = jnp.mean(jnp.square(x - mean), axis=-1, keepdims=True)
    return (x - mean) * lax.rsqrt(var + LN_EPS) * gamma + beta


# --------------------------------------------------------------------------
# fused transformer-stack kernel
# --------------------------------------------------------------------------


def _transformer_stack_kernel(x_ref, vec_ref, wqkv_ref, wout_ref, w1_ref, w2_ref,
                              o_ref, act_ref, attn_ref, *, heads, dim_head, dim,
                              mlp_dim, n_pad, n_valid, batch_tile, use_tanh_gelu):
    layer = pl.program_id(1)

    # Load this batch-tile's tokens into the resident VMEM activation once.
    @pl.when(layer == 0)
    def _init():
        act_ref[...] = x_ref[0].astype(jnp.float32)

    x = act_ref[...]                       # (Bt*n_pad, dim) f32, resident
    inner = heads * dim_head

    # Packed per-layer vectors: one (8, P) tile instead of 7 tiny operands.
    vecs = vec_ref[0]
    ln1_g, ln1_b = vecs[0:1, :dim], vecs[1:2, :dim]
    b_out = vecs[2:3, :dim]
    ln2_g, ln2_b = vecs[3:4, :dim], vecs[4:5, :dim]
    b2 = vecs[5:6, :dim]
    b1 = vecs[6:7, :mlp_dim]

    # ---------------- PreNorm(Attention) + residual ----------------
    xn = _layernorm(x, ln1_g, ln1_b)
    # single QKV projection over ALL folded batch rows
    qkv = jnp.dot(xn.astype(jnp.bfloat16), wqkv_ref[0],
                  preferred_element_type=jnp.float32)          # (Bt*n_pad, 3*inner)
    scale = dim_head ** (-0.5)
    q = (qkv[:, :inner] * scale).astype(jnp.bfloat16)
    k = qkv[:, inner:2 * inner].astype(jnp.bfloat16)
    v = qkv[:, 2 * inner:].astype(jnp.bfloat16)

    # Mask padded key columns (tokens were zero-padded to a sublane multiple).
    if n_valid < n_pad:
        key_mask = lax.broadcasted_iota(jnp.int32, (n_pad, n_pad), 1) < n_valid
    else:
        key_mask = None

    # Per-(batch-element, head) attention.  Each head's output is written into a
    # lane-offset slice of the VMEM scratch: no concat relayout, and the score /
    # prob intermediates die every iteration (bounded vreg live ranges).
    for b in range(batch_tile):            # static, small
        r0, r1 = b * n_pad, (b + 1) * n_pad
        for h in range(heads):             # static, small
            c0, c1 = h * dim_head, (h + 1) * dim_head
            qh = q[r0:r1, c0:c1]
            kh = k[r0:r1, c0:c1]
            vh = v[r0:r1, c0:c1]
            # Q @ K^T without an explicit transpose: contract last axes directly.
            dots = lax.dot_general(qh, kh, (((1,), (1,)), ((), ())),
                                   preferred_element_type=jnp.float32)
            if key_mask is not None:
                dots = jnp.where(key_mask, dots, jnp.float32(-1e30))
            dots = dots - jnp.max(dots, axis=-1, keepdims=True)
            p = jnp.exp(dots)
            inv = pl.reciprocal(jnp.sum(p, axis=-1, keepdims=True), approx=True)
            oh = jnp.dot(p.astype(jnp.bfloat16), vh,
                         preferred_element_type=jnp.float32) * inv
            attn_ref[r0:r1, c0:c1] = oh

    # Single K=inner output projection over all folded batch rows.
    proj = jnp.dot(attn_ref[...].astype(jnp.bfloat16), wout_ref[0],
                   preferred_element_type=jnp.float32)
    x = x + proj + b_out

    # ---------------- PreNorm(FeedForward) + residual ----------------
    xn2 = _layernorm(x, ln2_g, ln2_b)
    h1 = jnp.dot(xn2.astype(jnp.bfloat16), w1_ref[0],
                 preferred_element_type=jnp.float32) + b1
    if use_tanh_gelu:
        # tanh GELU: routes through the EUP slot (idle during the MLP epilogue);
        # ~1e-3 abs deviation from the exact erf GELU, within tolerance here.
        h1 = 0.5 * h1 * (1.0 + jnp.tanh(_SQRT_2_OVER_PI *
                                        (h1 + 0.044715 * h1 * h1 * h1)))
    else:
        # exact (erf-based) GELU, matching torch.nn.GELU default
        h1 = 0.5 * h1 * (1.0 + lax.erf(h1 * _INV_SQRT2))
    y = jnp.dot(h1.astype(jnp.bfloat16), w2_ref[0],
                preferred_element_type=jnp.float32) + b2
    x = x + y

    act_ref[...] = x

    @pl.when(layer == pl.num_programs(1) - 1)
    def _finalize():
        o_ref[0] = x.astype(o_ref.dtype)


def _pack_layer_vectors(params, dim, mlp_dim):
    """Pack per-layer LN/bias vectors into one lane-dense (depth, 8, P) array."""
    P = -(-max(dim, mlp_dim) // 128) * 128          # lane-dense packed width
    depth = params["ln1_g"].shape[0]

    def row(v):
        return jnp.pad(v, ((0, 0), (0, P - v.shape[-1])))

    rows = [
        row(params["ln1_g"]), row(params["ln1_b"]), row(params["b_out"]),
        row(params["ln2_g"]), row(params["ln2_b"]), row(params["b2"]),
        row(params["b1"]), jnp.zeros((depth, P), jnp.float32),
    ]
    return jnp.stack(rows, axis=1)                  # (depth, 8, P)


def _choose_batch_tile(B, n_pad, target_rows=256):
    """How many batch elements to fold into the M dim of one grid step.

    Larger tiles amortize per-layer weight DMA over more rows and fill the
    256-row MXU tile on v6e/v7x; keep >= 2 batch tiles when B allows it so the
    "parallel" grid axis feeds both v7x TensorCores.
    """
    candidates = [bt for bt in range(1, B + 1)
                  if B % bt == 0 and bt * n_pad <= target_rows]
    if not candidates:
        return 1
    two_plus = [bt for bt in candidates if B // bt >= 2]
    return max(two_plus) if two_plus else max(candidates)


def transformer_forward(x, params, *, heads, dim_head, mlp_dim, use_tanh_gelu=True):
    """Fused Pallas transformer stack. x: (B, N, dim) f32 -> (B, N, dim) f32."""
    B, N, D = x.shape
    inner = heads * dim_head
    depth = params["wqkv"].shape[0]

    # Sublane-align the token axis; padded key columns are masked in the kernel.
    n_pad = -(-N // 8) * 8
    bt = _choose_batch_tile(B, n_pad)
    nbt = B // bt
    m_rows = bt * n_pad

    # Pad, then fold bt batch elements into the M (row) dimension per grid step.
    # (always materialized -> the input/output alias below is real)
    x_in = jnp.pad(x, ((0, 0), (0, n_pad - N), (0, 0))).reshape(nbt, m_rows, D)

    vecs = _pack_layer_vectors(params, D, mlp_dim)           # (depth, 8, P) f32
    # bf16 matmul operands (full-rate MXU, half the weight bytes); f32 accumulate.
    # TODO(synk): on v7x the MXU also takes fp8 -- optional extra 2x on weight
    # bytes / MXU rate for the big projections if the accuracy budget allows.
    wqkv = params["wqkv"].astype(jnp.bfloat16)               # (depth, D, 3*inner)
    wout = params["wout"].astype(jnp.bfloat16)               # (depth, inner, D)
    w1 = params["w1"].astype(jnp.bfloat16)                   # (depth, D, mlp_dim)
    w2 = params["w2"].astype(jnp.bfloat16)                   # (depth, mlp_dim, D)

    kernel = functools.partial(
        _transformer_stack_kernel, heads=heads, dim_head=dim_head, dim=D,
        mlp_dim=mlp_dim, n_pad=n_pad, n_valid=N, batch_tile=bt,
        use_tanh_gelu=use_tanh_gelu)

    per_layer_flops = (2 * n_pad * D * 3 * inner               # QKV projection
                       + 4 * heads * n_pad * n_pad * dim_head  # scores + attn@V
                       + 2 * n_pad * inner * D                 # output projection
                       + 4 * n_pad * D * mlp_dim)              # MLP
    weight_bytes = 2 * (wqkv.size + wout.size + w1.size + w2.size)
    cost = pl.CostEstimate(
        flops=int(B * depth * per_layer_flops),
        transcendentals=int(B * depth * (heads * n_pad * n_pad + n_pad * mlp_dim)),
        bytes_accessed=int(2 * B * n_pad * D * 4              # acts in + out
                           + nbt * weight_bytes               # weights per tile
                           + nbt * 4 * vecs.size),
    )

    # Explicit VMEM budget: double-buffered per-layer weights + in/out activation
    # blocks + resident scratches + large intermediates, with 2x headroom.
    # Clamped to [32 MiB, 64 MiB] so it is valid on every generation (v7x has
    # only 64 MiB physical VMEM; v5e's scoped default is just 16 MiB).
    per_layer_weight_bytes = 2 * (wqkv[0].size + wout[0].size +
                                  w1[0].size + w2[0].size)
    act_block_bytes = 4 * m_rows * D
    vmem_need = (2 * per_layer_weight_bytes                    # double-buffered
                 + 4 * act_block_bytes                         # in/out blocks
                 + act_block_bytes + 4 * m_rows * inner        # resident scratches
                 + 4 * m_rows * (3 * inner + mlp_dim)          # qkv / mlp interm.
                 + 2 * 4 * vecs[0].size)
    vmem_limit = int(min(max(2 * vmem_need, 32 << 20), 64 << 20))
    # TODO(synk): at production ViT dims (D=768, mlp=3072) additionally K/N-tile
    # w1/w2 (nested pltpu.emit_pipeline over mlp_dim) or use pl.Buffered(1) on
    # the largest weight operands so the working set fits v7x / v5e budgets.

    def layer_spec(arr):
        return pl.BlockSpec((1,) + arr.shape[1:], lambda b, l: (l, 0, 0))

    out = pl.pallas_call(
        kernel,
        out_shape=jax.ShapeDtypeStruct((nbt, m_rows, D), jnp.float32),
        grid_spec=pltpu.PrefetchScalarGridSpec(
            num_scalar_prefetch=0,
            grid=(nbt, depth),
            in_specs=[
                pl.BlockSpec((1, m_rows, D), lambda b, l: (b, 0, 0)),  # activations
                layer_spec(vecs),                                      # packed vecs
                layer_spec(wqkv),
                layer_spec(wout),
                layer_spec(w1),
                layer_spec(w2),
            ],
            out_specs=pl.BlockSpec((1, m_rows, D), lambda b, l: (b, 0, 0)),
            scratch_shapes=[
                pltpu.VMEM((m_rows, D), jnp.float32),      # resident activations
                pltpu.VMEM((m_rows, inner), jnp.float32),  # per-head attn assembly
            ],
        ),
        compiler_params=pltpu.CompilerParams(
            dimension_semantics=("parallel", "arbitrary"),
            vmem_limit_bytes=vmem_limit,
        ),
        input_output_aliases={0: 0},        # output reuses the activation buffer
        cost_estimate=cost,
    )(x_in, vecs, wqkv, wout, w1, w2)

    return out.reshape(B, n_pad, D)[:, :N, :]


# --------------------------------------------------------------------------
# ViT_WSCSL_weight forward (embedding / head in plain JAX, transformer in Pallas)
# --------------------------------------------------------------------------


def embed_tokens(img, weight, params, *, patch_size, npool):
    B, C, H, W = img.shape
    p = patch_size
    hh, ww = H // p, W // p
    # Rearrange('b c (h p1) (w p2) -> b (h w) (p1 p2 c)')
    x = img.reshape(B, C, hh, p, ww, p)
    x = x.transpose(0, 2, 4, 3, 5, 1).reshape(B, hh * ww, p * p * C)
    x = x @ params["patch_w"] + params["patch_b"]            # patch embedding
    D = x.shape[-1]
    cls = jnp.broadcast_to(params["cls_token"], (B, 1, D))
    con = jnp.broadcast_to(params["con_token"], (B, npool, D)) * weight[:, :, None]
    x = jnp.concatenate([cls, con, x], axis=1)
    x = x + params["pos_embedding"]
    # emb_dropout = 0.0 -> no-op
    return x


def vit_forward(img, weight, params, *, patch_size, npool, heads, dim_head, mlp_dim):
    x = embed_tokens(img, weight, params, patch_size=patch_size, npool=npool)
    x = transformer_forward(x, params, heads=heads, dim_head=dim_head,
                            mlp_dim=mlp_dim)
    class_emb = x[:, 0]
    return _layernorm(class_emb, params["final_g"], params["final_b"])


# --------------------------------------------------------------------------
# plain-JAX reference (f32 end-to-end, mirrors the PyTorch module)
# --------------------------------------------------------------------------


def transformer_reference(x, params, *, heads, dim_head):
    depth = params["wqkv"].shape[0]
    inner = heads * dim_head
    B, N, _ = x.shape
    for l in range(depth):
        xn = _layernorm(x, params["ln1_g"][l], params["ln1_b"][l])
        qkv = xn @ params["wqkv"][l]
        q, k, v = jnp.split(qkv, 3, axis=-1)
        rs = lambda t: t.reshape(B, N, heads, dim_head).transpose(0, 2, 1, 3)
        q, k, v = rs(q), rs(k), rs(v)
        dots = jnp.einsum("bhnd,bhmd->bhnm", q, k) * dim_head ** (-0.5)
        attn = jax.nn.softmax(dots, axis=-1)
        out = jnp.einsum("bhnm,bhmd->bhnd", attn, v)
        out = out.transpose(0, 2, 1, 3).reshape(B, N, inner)
        x = out @ params["wout"][l] + params["b_out"][l] + x

        xn = _layernorm(x, params["ln2_g"][l], params["ln2_b"][l])
        h = jax.nn.gelu(xn @ params["w1"][l] + params["b1"][l], approximate=False)
        x = h @ params["w2"][l] + params["b2"][l] + x
    return x


def vit_reference(img, weight, params, *, patch_size, npool, heads, dim_head):
    x = embed_tokens(img, weight, params, patch_size=patch_size, npool=npool)
    x = transformer_reference(x, params, heads=heads, dim_head=dim_head)
    return _layernorm(x[:, 0], params["final_g"], params["final_b"])


# --------------------------------------------------------------------------
# parameter init
# --------------------------------------------------------------------------


def init_vit_params(key, *, image_size, patch_size, channels, dim, depth, npool,
                    heads, dim_head, mlp_dim):
    inner = heads * dim_head
    num_patches = (image_size // patch_size) ** 2
    patch_dim = channels * patch_size * patch_size
    n_tokens = num_patches + 1 + npool
    ks = jax.random.split(key, 18)
    w = lambda k, shape, s=0.2: s * jax.random.normal(k, shape, jnp.float32)
    return dict(
        patch_w=w(ks[0], (patch_dim, dim)),
        patch_b=w(ks[1], (dim,), 0.1),
        cls_token=jax.random.normal(ks[2], (1, 1, dim), jnp.float32),
        con_token=jax.random.normal(ks[3], (1, npool, dim), jnp.float32),
        pos_embedding=jax.random.normal(ks[4], (1, n_tokens, dim), jnp.float32),
        ln1_g=1.0 + w(ks[5], (depth, dim), 0.1),
        ln1_b=w(ks[6], (depth, dim), 0.1),
        wqkv=w(ks[7], (depth, dim, 3 * inner)),
        wout=w(ks[8], (depth, inner, dim)),
        b_out=w(ks[9], (depth, dim), 0.1),
        ln2_g=1.0 + w(ks[10], (depth, dim), 0.1),
        ln2_b=w(ks[11], (depth, dim), 0.1),
        w1=w(ks[12], (depth, dim, mlp_dim)),
        b1=w(ks[13], (depth, mlp_dim), 0.1),
        w2=w(ks[14], (depth, mlp_dim, dim)),
        b2=w(ks[15], (depth, dim), 0.1),
        final_g=1.0 + w(ks[16], (dim,), 0.1),
        final_b=w(ks[17], (dim,), 0.1),
    )


# --------------------------------------------------------------------------
# main
# --------------------------------------------------------------------------

if __name__ == "__main__":
    image_size, patch_size, channels = 16, 4, 3
    dim, depth, npool = 32, 2, 2
    heads, dim_head, mlp_dim = 4, 8, 64
    B = 4   # exercises batch folding: 2 batch tiles x 2 folded elements each

    key = jax.random.PRNGKey(0)
    k_img, k_w, k_p = jax.random.split(key, 3)
    img = jax.random.normal(k_img, (B, channels, image_size, image_size), jnp.float32)
    weight = jax.random.normal(k_w, (B, npool), jnp.float32)
    params = init_vit_params(k_p, image_size=image_size, patch_size=patch_size,
                             channels=channels, dim=dim, depth=depth, npool=npool,
                             heads=heads, dim_head=dim_head, mlp_dim=mlp_dim)

    fwd = jax.jit(functools.partial(vit_forward, patch_size=patch_size, npool=npool,
                                    heads=heads, dim_head=dim_head, mlp_dim=mlp_dim))
    out = jax.block_until_ready(fwd(img, weight, params))

    ref = vit_reference(img, weight, params, patch_size=patch_size, npool=npool,
                        heads=heads, dim_head=dim_head)
    # kernel uses bf16 MXU operands (f32 accumulation), approx EUP reciprocal and
    # tanh GELU -> compare with a loose tolerance against the f32 / erf reference.
    np.testing.assert_allclose(np.asarray(out), np.asarray(ref), rtol=5e-2, atol=5e-2)

    print("KERNEL_OK")
</pallas_src>

<mosaic_0001>
module attributes {stable_mosaic.version = 11 : i64} {
  func.func @_transformer_stack_kernel(%arg0: i32, %arg1: i32, %arg2: memref<1x48x32xf32, #tpu.memory_space<vmem>>, %arg3: memref<1x8x128xf32, #tpu.memory_space<vmem>>, %arg4: memref<1x32x96xbf16, #tpu.memory_space<vmem>>, %arg5: memref<1x32x32xbf16, #tpu.memory_space<vmem>>, %arg6: memref<1x32x64xbf16, #tpu.memory_space<vmem>>, %arg7: memref<1x64x32xbf16, #tpu.memory_space<vmem>>, %arg8: memref<1x48x32xf32, #tpu.memory_space<vmem>>, %arg9: memref<48x32xf32, #tpu.memory_space<vmem>>, %arg10: memref<48x32xf32, #tpu.memory_space<vmem>>) attributes {dimension_semantics = [#tpu.dimension_semantics<parallel>, #tpu.dimension_semantics<arbitrary>], iteration_bounds = array<i64: 2, 2>, scalar_prefetch = 0 : i64, scratch_operands = 2 : i64, tpu.core_type = #tpu.core_type<tc>, window_params = [{transform_indices = @transform_0, window_bounds = array<i64: 1, 48, 32>}, {transform_indices = @transform_1, window_bounds = array<i64: 1, 8, 128>}, {transform_indices = @transform_2, window_bounds = array<i64: 1, 32, 96>}, {transform_indices = @transform_3, window_bounds = array<i64: 1, 32, 32>}, {transform_indices = @transform_4, window_bounds = array<i64: 1, 32, 64>}, {transform_indices = @transform_5, window_bounds = array<i64: 1, 64, 32>}, {transform_indices = @transform_6, window_bounds = array<i64: 1, 48, 32>}]} {
    %c0_i32 = arith.constant 0 : i32
    %0 = arith.cmpi eq, %arg1, %c0_i32 : i32
    %1 = arith.extui %0 : i1 to i32
    %c0_i32_0 = arith.constant 0 : i32
    %2 = arith.cmpi ne, %1, %c0_i32_0 : i32
    scf.if %2 {
      %c0_93 = arith.constant 0 : index
      %c0_94 = arith.constant 0 : index
      %c0_95 = arith.constant 0 : index
      %262 = vector.load %arg2[%c0_93, %c0_94, %c0_95] : memref<1x48x32xf32, #tpu.memory_space<vmem>>, vector<1x48x32xf32>
      %263 = vector.shape_cast %262 : vector<1x48x32xf32> to vector<48x32xf32>
      %c0_96 = arith.constant 0 : index
      %c0_97 = arith.constant 0 : index
      %264 = vector.load %arg9[%c0_96, %c0_97] : memref<48x32xf32, #tpu.memory_space<vmem>>, vector<48x32xf32>
      tpu.vector_store %arg9[%c0_96, %c0_97], %263 {strides = array<i32>} : memref<48x32xf32, #tpu.memory_space<vmem>>, vector<48x32xf32>,
    } else {
    }
    %c0 = arith.constant 0 : index
    %c0_1 = arith.constant 0 : index
    %3 = vector.load %arg9[%c0, %c0_1] : memref<48x32xf32, #tpu.memory_space<vmem>>, vector<48x32xf32>
    %c0_2 = arith.constant 0 : index
    %c0_3 = arith.constant 0 : index
    %c0_4 = arith.constant 0 : index
    %4 = vector.load %arg3[%c0_2, %c0_3, %c0_4] : memref<1x8x128xf32, #tpu.memory_space<vmem>>, vector<1x8x128xf32>
    %5 = vector.shape_cast %4 : vector<1x8x128xf32> to vector<8x128xf32>
    %6 = vector.extract_strided_slice %5 {offsets = [0, 0], sizes = [1, 32], strides = [1, 1]} : vector<8x128xf32> to vector<1x32xf32>
    %7 = vector.extract_strided_slice %5 {offsets = [1, 0], sizes = [1, 32], strides = [1, 1]} : vector<8x128xf32> to vector<1x32xf32>
    %8 = vector.extract_strided_slice %5 {offsets = [2, 0], sizes = [1, 32], strides = [1, 1]} : vector<8x128xf32> to vector<1x32xf32>
    %9 = vector.extract_strided_slice %5 {offsets = [3, 0], sizes = [1, 32], strides = [1, 1]} : vector<8x128xf32> to vector<1x32xf32>
    %10 = vector.extract_strided_slice %5 {offsets = [4, 0], sizes = [1, 32], strides = [1, 1]} : vector<8x128xf32> to vector<1x32xf32>
    %11 = vector.extract_strided_slice %5 {offsets = [5, 0], sizes = [1, 32], strides = [1, 1]} : vector<8x128xf32> to vector<1x32xf32>
    %12 = vector.extract_strided_slice %5 {offsets = [6, 0], sizes = [1, 64], strides = [1, 1]} : vector<8x128xf32> to vector<1x64xf32>
    %cst = arith.constant dense<0.000000e+00> : vector<48xf32>
    %13 = vector.multi_reduction <add>, %3, %cst [1] : vector<48x32xf32> to vector<48xf32>
    %14 = vector.shape_cast %13 : vector<48xf32> to vector<48x1xf32>
    %cst_5 = arith.constant 3.200000e+01 : f32
    %15 = vector.broadcast %cst_5 : f32 to vector<48x1xf32>
    %16 = arith.divf %14, %15 : vector<48x1xf32>
    %17 = vector.broadcast %16 : vector<48x1xf32> to vector<48x32xf32>
    %18 = arith.subf %3, %17 : vector<48x32xf32>
    %19 = arith.mulf %18, %18 : vector<48x32xf32>
    %cst_6 = arith.constant dense<0.000000e+00> : vector<48xf32>
    %20 = vector.multi_reduction <add>, %19, %cst_6 [1] : vector<48x32xf32> to vector<48xf32>
    %21 = vector.shape_cast %20 : vector<48xf32> to vector<48x1xf32>
    %cst_7 = arith.constant 3.200000e+01 : f32
    %22 = vector.broadcast %cst_7 : f32 to vector<48x1xf32>
    %23 = arith.divf %21, %22 : vector<48x1xf32>
    %24 = vector.broadcast %16 : vector<48x1xf32> to vector<48x32xf32>
    %25 = arith.subf %3, %24 : vector<48x32xf32>
    %cst_8 = arith.constant 9.99999974E-6 : f32
    %26 = vector.broadcast %cst_8 : f32 to vector<48x1xf32>
    %27 = arith.addf %23, %26 : vector<48x1xf32>
    %28 = math.rsqrt %27 : vector<48x1xf32>
    %29 = vector.broadcast %28 : vector<48x1xf32> to vector<48x32xf32>
    %30 = arith.mulf %25, %29 : vector<48x32xf32>
    %31 = vector.broadcast %6 : vector<1x32xf32> to vector<48x32xf32>
    %32 = arith.mulf %30, %31 : vector<48x32xf32>
    %33 = vector.broadcast %7 : vector<1x32xf32> to vector<48x32xf32>
    %34 = arith.addf %32, %33 : vector<48x32xf32>
    %35 = arith.truncf %34 : vector<48x32xf32> to vector<48x32xbf16>
    %c0_9 = arith.constant 0 : index
    %c0_10 = arith.constant 0 : index
    %c0_11 = arith.constant 0 : index
    %36 = vector.load %arg4[%c0_9, %c0_10, %c0_11] : memref<1x32x96xbf16, #tpu.memory_space<vmem>>, vector<1x32x96xbf16>
    %37 = vector.shape_cast %36 : vector<1x32x96xbf16> to vector<32x96xbf16>
    %cst_12 = arith.constant dense<0.000000e+00> : vector<48x96xf32>
    %38 = tpu.matmul %35, %37, %cst_12 {dimension_numbers = #tpu.dot_dimension_numbers<[1], [0], [0], [1], [0, 0, 1, 1], [], []>} : vector<48x32xbf16>, vector<32x96xbf16>, vector<48x96xf32> -> vector<48x96xf32>
    %39 = vector.extract_strided_slice %38 {offsets = [0, 0], sizes = [48, 32], strides = [1, 1]} : vector<48x96xf32> to vector<48x32xf32>
    %cst_13 = arith.constant 0.353553385 : f32
    %40 = vector.broadcast %cst_13 : f32 to vector<48x32xf32>
    %41 = arith.mulf %39, %40 : vector<48x32xf32>
    %42 = arith.truncf %41 : vector<48x32xf32> to vector<48x32xbf16>
    %43 = vector.extract_strided_slice %38 {offsets = [0, 32], sizes = [48, 32], strides = [1, 1]} : vector<48x96xf32> to vector<48x32xf32>
    %44 = arith.truncf %43 : vector<48x32xf32> to vector<48x32xbf16>
    %45 = vector.extract_strided_slice %38 {offsets = [0, 64], sizes = [48, 32], strides = [1, 1]} : vector<48x96xf32> to vector<48x32xf32>
    %46 = arith.truncf %45 : vector<48x32xf32> to vector<48x32xbf16>
    %47 = tpu.iota {dimensions = array<i32: 1>} : vector<24x24xi32>
    %c19_i32 = arith.constant 19 : i32
    %48 = vector.broadcast %c19_i32 : i32 to vector<24x24xi32>
    %49 = arith.cmpi slt, %47, %48 : vector<24x24xi32>
    %50 = vector.extract_strided_slice %42 {offsets = [0, 0], sizes = [24, 8], strides = [1, 1]} : vector<48x32xbf16> to vector<24x8xbf16>
    %51 = vector.extract_strided_slice %44 {offsets = [0, 0], sizes = [24, 8], strides = [1, 1]} : vector<48x32xbf16> to vector<24x8xbf16>
    %52 = vector.extract_strided_slice %46 {offsets = [0, 0], sizes = [24, 8], strides = [1, 1]} : vector<48x32xbf16> to vector<24x8xbf16>
    %cst_14 = arith.constant dense<0.000000e+00> : vector<24x24xf32>
    %53 = tpu.matmul %50, %51, %cst_14 {dimension_numbers = #tpu.dot_dimension_numbers<[1], [1], [0], [0], [0, 0, 1, 0], [], []>} : vector<24x8xbf16>, vector<24x8xbf16>, vector<24x24xf32> -> vector<24x24xf32>
    %cst_15 = arith.constant -1.000000e+30 : f32
    %54 = vector.broadcast %cst_15 : f32 to vector<24x24xf32>
    %55 = arith.select %49, %53, %54 : vector<24x24xi1>, vector<24x24xf32>
    %cst_16 = arith.constant dense<0xFF800000> : vector<24xf32>
    %56 = vector.multi_reduction <maximumf>, %55, %cst_16 [1] : vector<24x24xf32> to vector<24xf32>
    %57 = vector.shape_cast %56 : vector<24xf32> to vector<24x1xf32>
    %58 = vector.broadcast %57 : vector<24x1xf32> to vector<24x24xf32>
    %59 = arith.subf %55, %58 : vector<24x24xf32>
    %60 = math.exp %59 : vector<24x24xf32>
    %cst_17 = arith.constant dense<0.000000e+00> : vector<24xf32>
    %61 = vector.multi_reduction <add>, %60, %cst_17 [1] : vector<24x24xf32> to vector<24xf32>
    %62 = vector.shape_cast %61 : vector<24xf32> to vector<24x1xf32>
    %63 = tpu.reciprocal %62 {approx = true} : vector<24x1xf32> -> vector<24x1xf32>
    %64 = arith.truncf %60 : vector<24x24xf32> to vector<24x24xbf16>
    %cst_18 = arith.constant dense<0.000000e+00> : vector<24x8xf32>
    %65 = tpu.matmul %64, %52, %cst_18 {dimension_numbers = #tpu.dot_dimension_numbers<[1], [0], [0], [1], [0, 0, 1, 1], [], []>} : vector<24x24xbf16>, vector<24x8xbf16>, vector<24x8xf32> -> vector<24x8xf32>
    %66 = vector.broadcast %63 : vector<24x1xf32> to vector<24x8xf32>
    %67 = arith.mulf %65, %66 : vector<24x8xf32>
    %c0_19 = arith.constant 0 : index
    %c0_20 = arith.constant 0 : index
    %68 = vector.load %arg10[%c0_19, %c0_20] : memref<48x32xf32, #tpu.memory_space<vmem>>, vector<24x8xf32>
    tpu.vector_store %arg10[%c0_19, %c0_20], %67 {strides = array<i32>} : memref<48x32xf32, #tpu.memory_space<vmem>>, vector<24x8xf32>,
    %69 = vector.extract_strided_slice %42 {offsets = [0, 8], sizes = [24, 8], strides = [1, 1]} : vector<48x32xbf16> to vector<24x8xbf16>
    %70 = vector.extract_strided_slice %44 {offsets = [0, 8], sizes = [24, 8], strides = [1, 1]} : vector<48x32xbf16> to vector<24x8xbf16>
    %71 = vector.extract_strided_slice %46 {offsets = [0, 8], sizes = [24, 8], strides = [1, 1]} : vector<48x32xbf16> to vector<24x8xbf16>
    %cst_21 = arith.constant dense<0.000000e+00> : vector<24x24xf32>
    %72 = tpu.matmul %69, %70, %cst_21 {dimension_numbers = #tpu.dot_dimension_numbers<[1], [1], [0], [0], [0, 0, 1, 0], [], []>} : vector<24x8xbf16>, vector<24x8xbf16>, vector<24x24xf32> -> vector<24x24xf32>
    %cst_22 = arith.constant -1.000000e+30 : f32
    %73 = vector.broadcast %cst_22 : f32 to vector<24x24xf32>
    %74 = arith.select %49, %72, %73 : vector<24x24xi1>, vector<24x24xf32>
    %cst_23 = arith.constant dense<0xFF800000> : vector<24xf32>
    %75 = vector.multi_reduction <maximumf>, %74, %cst_23 [1] : vector<24x24xf32> to vector<24xf32>
    %76 = vector.shape_cast %75 : vector<24xf32> to vector<24x1xf32>
    %77 = vector.broadcast %76 : vector<24x1xf32> to vector<24x24xf32>
    %78 = arith.subf %74, %77 : vector<24x24xf32>
    %79 = math.exp %78 : vector<24x24xf32>
    %cst_24 = arith.constant dense<0.000000e+00> : vector<24xf32>
    %80 = vector.multi_reduction <add>, %79, %cst_24 [1] : vector<24x24xf32> to vector<24xf32>
    %81 = vector.shape_cast %80 : vector<24xf32> to vector<24x1xf32>
    %82 = tpu.reciprocal %81 {approx = true} : vector<24x1xf32> -> vector<24x1xf32>
    %83 = arith.truncf %79 : vector<24x24xf32> to vector<24x24xbf16>
    %cst_25 = arith.constant dense<0.000000e+00> : vector<24x8xf32>
    %84 = tpu.matmul %83, %71, %cst_25 {dimension_numbers = #tpu.dot_dimension_numbers<[1], [0], [0], [1], [0, 0, 1, 1], [], []>} : vector<24x24xbf16>, vector<24x8xbf16>, vector<24x8xf32> -> vector<24x8xf32>
    %85 = vector.broadcast %82 : vector<24x1xf32> to vector<24x8xf32>
    %86 = arith.mulf %84, %85 : vector<24x8xf32>
    %c0_26 = arith.constant 0 : index
    %c8 = arith.constant 8 : index
    %87 = vector.load %arg10[%c0_26, %c8] : memref<48x32xf32, #tpu.memory_space<vmem>>, vector<24x8xf32>
    tpu.vector_store %arg10[%c0_26, %c8], %86 {strides = array<i32>} : memref<48x32xf32, #tpu.memory_space<vmem>>, vector<24x8xf32>,
    %88 = vector.extract_strided_slice %42 {offsets = [0, 16], sizes = [24, 8], strides = [1, 1]} : vector<48x32xbf16> to vector<24x8xbf16>
    %89 = vector.extract_strided_slice %44 {offsets = [0, 16], sizes = [24, 8], strides = [1, 1]} : vector<48x32xbf16> to vector<24x8xbf16>
    %90 = vector.extract_strided_slice %46 {offsets = [0, 16], sizes = [24, 8], strides = [1, 1]} : vector<48x32xbf16> to vector<24x8xbf16>
    %cst_27 = arith.constant dense<0.000000e+00> : vector<24x24xf32>
    %91 = tpu.matmul %88, %89, %cst_27 {dimension_numbers = #tpu.dot_dimension_numbers<[1], [1], [0], [0], [0, 0, 1, 0], [], []>} : vector<24x8xbf16>, vector<24x8xbf16>, vector<24x24xf32> -> vector<24x24xf32>
    %cst_28 = arith.constant -1.000000e+30 : f32
    %92 = vector.broadcast %cst_28 : f32 to vector<24x24xf32>
    %93 = arith.select %49, %91, %92 : vector<24x24xi1>, vector<24x24xf32>
    %cst_29 = arith.constant dense<0xFF800000> : vector<24xf32>
    %94 = vector.multi_reduction <maximumf>, %93, %cst_29 [1] : vector<24x24xf32> to vector<24xf32>
    %95 = vector.shape_cast %94 : vector<24xf32> to vector<24x1xf32>
    %96 = vector.broadcast %95 : vector<24x1xf32> to vector<24x24xf32>
    %97 = arith.subf %93, %96 : vector<24x24xf32>
    %98 = math.exp %97 : vector<24x24xf32>
    %cst_30 = arith.constant dense<0.000000e+00> : vector<24xf32>
    %99 = vector.multi_reduction <add>, %98, %cst_30 [1] : vector<24x24xf32> to vector<24xf32>
    %100 = vector.shape_cast %99 : vector<24xf32> to vector<24x1xf32>
    %101 = tpu.reciprocal %100 {approx = true} : vector<24x1xf32> -> vector<24x1xf32>
    %102 = arith.truncf %98 : vector<24x24xf32> to vector<24x24xbf16>
    %cst_31 = arith.constant dense<0.000000e+00> : vector<24x8xf32>
    %103 = tpu.matmul %102, %90, %cst_31 {dimension_numbers = #tpu.dot_dimension_numbers<[1], [0], [0], [1], [0, 0, 1, 1], [], []>} : vector<24x24xbf16>, vector<24x8xbf16>, vector<24x8xf32> -> vector<24x8xf32>
    %104 = vector.broadcast %101 : vector<24x1xf32> to vector<24x8xf32>
    %105 = arith.mulf %103, %104 : vector<24x8xf32>
    %c0_32 = arith.constant 0 : index
    %c16 = arith.constant 16 : index
    %106 = vector.load %arg10[%c0_32, %c16] : memref<48x32xf32, #tpu.memory_space<vmem>>, vector<24x8xf32>
    tpu.vector_store %arg10[%c0_32, %c16], %105 {strides = array<i32>} : memref<48x32xf32, #tpu.memory_space<vmem>>, vector<24x8xf32>,
    %107 = vector.extract_strided_slice %42 {offsets = [0, 24], sizes = [24, 8], strides = [1, 1]} : vector<48x32xbf16> to vector<24x8xbf16>
    %108 = vector.extract_strided_slice %44 {offsets = [0, 24], sizes = [24, 8], strides = [1, 1]} : vector<48x32xbf16> to vector<24x8xbf16>
    %109 = vector.extract_strided_slice %46 {offsets = [0, 24], sizes = [24, 8], strides = [1, 1]} : vector<48x32xbf16> to vector<24x8xbf16>
    %cst_33 = arith.constant dense<0.000000e+00> : vector<24x24xf32>
    %110 = tpu.matmul %107, %108, %cst_33 {dimension_numbers = #tpu.dot_dimension_numbers<[1], [1], [0], [0], [0, 0, 1, 0], [], []>} : vector<24x8xbf16>, vector<24x8xbf16>, vector<24x24xf32> -> vector<24x24xf32>
    %cst_34 = arith.constant -1.000000e+30 : f32
    %111 = vector.broadcast %cst_34 : f32 to vector<24x24xf32>
    %112 = arith.select %49, %110, %111 : vector<24x24xi1>, vector<24x24xf32>
    %cst_35 = arith.constant dense<0xFF800000> : vector<24xf32>
    %113 = vector.multi_reduction <maximumf>, %112, %cst_35 [1] : vector<24x24xf32> to vector<24xf32>
    %114 = vector.shape_cast %113 : vector<24xf32> to vector<24x1xf32>
    %115 = vector.broadcast %114 : vector<24x1xf32> to vector<24x24xf32>
    %116 = arith.subf %112, %115 : vector<24x24xf32>
    %117 = math.exp %116 : vector<24x24xf32>
    %cst_36 = arith.constant dense<0.000000e+00> : vector<24xf32>
    %118 = vector.multi_reduction <add>, %117, %cst_36 [1] : vector<24x24xf32> to vector<24xf32>
    %119 = vector.shape_cast %118 : vector<24xf32> to vector<24x1xf32>
    %120 = tpu.reciprocal %119 {approx = true} : vector<24x1xf32> -> vector<24x1xf32>
    %121 = arith.truncf %117 : vector<24x24xf32> to vector<24x24xbf16>
    %cst_37 = arith.constant dense<0.000000e+00> : vector<24x8xf32>
    %122 = tpu.matmul %121, %109, %cst_37 {dimension_numbers = #tpu.dot_dimension_numbers<[1], [0], [0], [1], [0, 0, 1, 1], [], []>} : vector<24x24xbf16>, vector<24x8xbf16>, vector<24x8xf32> -> vector<24x8xf32>
    %123 = vector.broadcast %120 : vector<24x1xf32> to vector<24x8xf32>
    %124 = arith.mulf %122, %123 : vector<24x8xf32>
    %c0_38 = arith.constant 0 : index
    %c24 = arith.constant 24 : index
    %125 = vector.load %arg10[%c0_38, %c24] : memref<48x32xf32, #tpu.memory_space<vmem>>, vector<24x8xf32>
    tpu.vector_store %arg10[%c0_38, %c24], %124 {strides = array<i32>} : memref<48x32xf32, #tpu.memory_space<vmem>>, vector<24x8xf32>,
    %126 = vector.extract_strided_slice %42 {offsets = [24, 0], sizes = [24, 8], strides = [1, 1]} : vector<48x32xbf16> to vector<24x8xbf16>
    %127 = vector.extract_strided_slice %44 {offsets = [24, 0], sizes = [24, 8], strides = [1, 1]} : vector<48x32xbf16> to vector<24x8xbf16>
    %128 = vector.extract_strided_slice %46 {offsets = [24, 0], sizes = [24, 8], strides = [1, 1]} : vector<48x32xbf16> to vector<24x8xbf16>
    %cst_39 = arith.constant dense<0.000000e+00> : vector<24x24xf32>
    %129 = tpu.matmul %126, %127, %cst_39 {dimension_numbers = #tpu.dot_dimension_numbers<[1], [1], [0], [0], [0, 0, 1, 0], [], []>} : vector<24x8xbf16>, vector<24x8xbf16>, vector<24x24xf32> -> vector<24x24xf32>
    %cst_40 = arith.constant -1.000000e+30 : f32
    %130 = vector.broadcast %cst_40 : f32 to vector<24x24xf32>
    %131 = arith.select %49, %129, %130 : vector<24x24xi1>, vector<24x24xf32>
    %cst_41 = arith.constant dense<0xFF800000> : vector<24xf32>
    %132 = vector.multi_reduction <maximumf>, %131, %cst_41 [1] : vector<24x24xf32> to vector<24xf32>
    %133 = vector.shape_cast %132 : vector<24xf32> to vector<24x1xf32>
    %134 = vector.broadcast %133 : vector<24x1xf32> to vector<24x24xf32>
    %135 = arith.subf %131, %134 : vector<24x24xf32>
    %136 = math.exp %135 : vector<24x24xf32>
    %cst_42 = arith.constant dense<0.000000e+00> : vector<24xf32>
    %137 = vector.multi_reduction <add>, %136, %cst_42 [1] : vector<24x24xf32> to vector<24xf32>
    %138 = vector.shape_cast %137 : vector<24xf32> to vector<24x1xf32>
    %139 = tpu.reciprocal %138 {approx = true} : vector<24x1xf32> -> vector<24x1xf32>
    %140 = arith.truncf %136 : vector<24x24xf32> to vector<24x24xbf16>
    %cst_43 = arith.constant dense<0.000000e+00> : vector<24x8xf32>
    %141 = tpu.matmul %140, %128, %cst_43 {dimension_numbers = #tpu.dot_dimension_numbers<[1], [0], [0], [1], [0, 0, 1, 1], [], []>} : vector<24x24xbf16>, vector<24x8xbf16>, vector<24x8xf32> -> vector<24x8xf32>
    %142 = vector.broadcast %139 : vector<24x1xf32> to vector<24x8xf32>
    %143 = arith.mulf %141, %142 : vector<24x8xf32>
    %c24_44 = arith.constant 24 : index
    %c0_45 = arith.constant 0 : index
    %144 = vector.load %arg10[%c24_44, %c0_45] : memref<48x32xf32, #tpu.memory_space<vmem>>, vector<24x8xf32>
    tpu.vector_store %arg10[%c24_44, %c0_45], %143 {strides = array<i32>} : memref<48x32xf32, #tpu.memory_space<vmem>>, vector<24x8xf32>,
    %145 = vector.extract_strided_slice %42 {offsets = [24, 8], sizes = [24, 8], strides = [1, 1]} : vector<48x32xbf16> to vector<24x8xbf16>
    %146 = vector.extract_strided_slice %44 {offsets = [24, 8], sizes = [24, 8], strides = [1, 1]} : vector<48x32xbf16> to vector<24x8xbf16>
    %147 = vector.extract_strided_slice %46 {offsets = [24, 8], sizes = [24, 8], strides = [1, 1]} : vector<48x32xbf16> to vector<24x8xbf16>
    %cst_46 = arith.constant dense<0.000000e+00> : vector<24x24xf32>
    %148 = tpu.matmul %145, %146, %cst_46 {dimension_numbers = #tpu.dot_dimension_numbers<[1], [1], [0], [0], [0, 0, 1, 0], [], []>} : vector<24x8xbf16>, vector<24x8xbf16>, vector<24x24xf32> -> vector<24x24xf32>
    %cst_47 = arith.constant -1.000000e+30 : f32
    %149 = vector.broadcast %cst_47 : f32 to vector<24x24xf32>
    %150 = arith.select %49, %148, %149 : vector<24x24xi1>, vector<24x24xf32>
    %cst_48 = arith.constant dense<0xFF800000> : vector<24xf32>
    %151 = vector.multi_reduction <maximumf>, %150, %cst_48 [1] : vector<24x24xf32> to vector<24xf32>
    %152 = vector.shape_cast %151 : vector<24xf32> to vector<24x1xf32>
    %153 = vector.broadcast %152 : vector<24x1xf32> to vector<24x24xf32>
    %154 = arith.subf %150, %153 : vector<24x24xf32>
    %155 = math.exp %154 : vector<24x24xf32>
    %cst_49 = arith.constant dense<0.000000e+00> : vector<24xf32>
    %156 = vector.multi_reduction <add>, %155, %cst_49 [1] : vector<24x24xf32> to vector<24xf32>
    %157 = vector.shape_cast %156 : vector<24xf32> to vector<24x1xf32>
    %158 = tpu.reciprocal %157 {approx = true} : vector<24x1xf32> -> vector<24x1xf32>
    %159 = arith.truncf %155 : vector<24x24xf32> to vector<24x24xbf16>
    %cst_50 = arith.constant dense<0.000000e+00> : vector<24x8xf32>
    %160 = tpu.matmul %159, %147, %cst_50 {dimension_numbers = #tpu.dot_dimension_numbers<[1], [0], [0], [1], [0, 0, 1, 1], [], []>} : vector<24x24xbf16>, vector<24x8xbf16>, vector<24x8xf32> -> vector<24x8xf32>
    %161 = vector.broadcast %158 : vector<24x1xf32> to vector<24x8xf32>
    %162 = arith.mulf %160, %161 : vector<24x8xf32>
    %c24_51 = arith.constant 24 : index
    %c8_52 = arith.constant 8 : index
    %163 = vector.load %arg10[%c24_51, %c8_52] : memref<48x32xf32, #tpu.memory_space<vmem>>, vector<24x8xf32>
    tpu.vector_store %arg10[%c24_51, %c8_52], %162 {strides = array<i32>} : memref<48x32xf32, #tpu.memory_space<vmem>>, vector<24x8xf32>,
    %164 = vector.extract_strided_slice %42 {offsets = [24, 16], sizes = [24, 8], strides = [1, 1]} : vector<48x32xbf16> to vector<24x8xbf16>
    %165 = vector.extract_strided_slice %44 {offsets = [24, 16], sizes = [24, 8], strides = [1, 1]} : vector<48x32xbf16> to vector<24x8xbf16>
    %166 = vector.extract_strided_slice %46 {offsets = [24, 16], sizes = [24, 8], strides = [1, 1]} : vector<48x32xbf16> to vector<24x8xbf16>
    %cst_53 = arith.constant dense<0.000000e+00> : vector<24x24xf32>
    %167 = tpu.matmul %164, %165, %cst_53 {dimension_numbers = #tpu.dot_dimension_numbers<[1], [1], [0], [0], [0, 0, 1, 0], [], []>} : vector<24x8xbf16>, vector<24x8xbf16>, vector<24x24xf32> -> vector<24x24xf32>
    %cst_54 = arith.constant -1.000000e+30 : f32
    %168 = vector.broadcast %cst_54 : f32 to vector<24x24xf32>
    %169 = arith.select %49, %167, %168 : vector<24x24xi1>, vector<24x24xf32>
    %cst_55 = arith.constant dense<0xFF800000> : vector<24xf32>
    %170 = vector.multi_reduction <maximumf>, %169, %cst_55 [1] : vector<24x24xf32> to vector<24xf32>
    %171 = vector.shape_cast %170 : vector<24xf32> to vector<24x1xf32>
    %172 = vector.broadcast %171 : vector<24x1xf32> to vector<24x24xf32>
    %173 = arith.subf %169, %172 : vector<24x24xf32>
    %174 = math.exp %173 : vector<24x24xf32>
    %cst_56 = arith.constant dense<0.000000e+00> : vector<24xf32>
    %175 = vector.multi_reduction <add>, %174, %cst_56 [1] : vector<24x24xf32> to vector<24xf32>
    %176 = vector.shape_cast %175 : vector<24xf32> to vector<24x1xf32>
    %177 = tpu.reciprocal %176 {approx = true} : vector<24x1xf32> -> vector<24x1xf32>
    %178 = arith.truncf %174 : vector<24x24xf32> to vector<24x24xbf16>
    %cst_57 = arith.constant dense<0.000000e+00> : vector<24x8xf32>
    %179 = tpu.matmul %178, %166, %cst_57 {dimension_numbers = #tpu.dot_dimension_numbers<[1], [0], [0], [1], [0, 0, 1, 1], [], []>} : vector<24x24xbf16>, vector<24x8xbf16>, vector<24x8xf32> -> vector<24x8xf32>
    %180 = vector.broadcast %177 : vector<24x1xf32> to vector<24x8xf32>
    %181 = arith.mulf %179, %180 : vector<24x8xf32>
    %c24_58 = arith.constant 24 : index
    %c16_59 = arith.constant 16 : index
    %182 = vector.load %arg10[%c24_58, %c16_59] : memref<48x32xf32, #tpu.memory_space<vmem>>, vector<24x8xf32>
    tpu.vector_store %arg10[%c24_58, %c16_59], %181 {strides = array<i32>} : memref<48x32xf32, #tpu.memory_space<vmem>>, vector<24x8xf32>,
    %183 = vector.extract_strided_slice %42 {offsets = [24, 24], sizes = [24, 8], strides = [1, 1]} : vector<48x32xbf16> to vector<24x8xbf16>
    %184 = vector.extract_strided_slice %44 {offsets = [24, 24], sizes = [24, 8], strides = [1, 1]} : vector<48x32xbf16> to vector<24x8xbf16>
    %185 = vector.extract_strided_slice %46 {offsets = [24, 24], sizes = [24, 8], strides = [1, 1]} : vector<48x32xbf16> to vector<24x8xbf16>
    %cst_60 = arith.constant dense<0.000000e+00> : vector<24x24xf32>
    %186 = tpu.matmul %183, %184, %cst_60 {dimension_numbers = #tpu.dot_dimension_numbers<[1], [1], [0], [0], [0, 0, 1, 0], [], []>} : vector<24x8xbf16>, vector<24x8xbf16>, vector<24x24xf32> -> vector<24x24xf32>
    %cst_61 = arith.constant -1.000000e+30 : f32
    %187 = vector.broadcast %cst_61 : f32 to vector<24x24xf32>
    %188 = arith.select %49, %186, %187 : vector<24x24xi1>, vector<24x24xf32>
    %cst_62 = arith.constant dense<0xFF800000> : vector<24xf32>
    %189 = vector.multi_reduction <maximumf>, %188, %cst_62 [1] : vector<24x24xf32> to vector<24xf32>
    %190 = vector.shape_cast %189 : vector<24xf32> to vector<24x1xf32>
    %191 = vector.broadcast %190 : vector<24x1xf32> to vector<24x24xf32>
    %192 = arith.subf %188, %191 : vector<24x24xf32>
    %193 = math.exp %192 : vector<24x24xf32>
    %cst_63 = arith.constant dense<0.000000e+00> : vector<24xf32>
    %194 = vector.multi_reduction <add>, %193, %cst_63 [1] : vector<24x24xf32> to vector<24xf32>
    %195 = vector.shape_cast %194 : vector<24xf32> to vector<24x1xf32>
    %196 = tpu.reciprocal %195 {approx = true} : vector<24x1xf32> -> vector<24x1xf32>
    %197 = arith.truncf %193 : vector<24x24xf32> to vector<24x24xbf16>
    %cst_64 = arith.constant dense<0.000000e+00> : vector<24x8xf32>
    %198 = tpu.matmul %197, %185, %cst_64 {dimension_numbers = #tpu.dot_dimension_numbers<[1], [0], [0], [1], [0, 0, 1, 1], [], []>} : vector<24x24xbf16>, vector<24x8xbf16>, vector<24x8xf32> -> vector<24x8xf32>
    %199 = vector.broadcast %196 : vector<24x1xf32> to vector<24x8xf32>
    %200 = arith.mulf %198, %199 : vector<24x8xf32>
    %c24_65 = arith.constant 24 : index
    %c24_66 = arith.constant 24 : index
    %201 = vector.load %arg10[%c24_65, %c24_66] : memref<48x32xf32, #tpu.memory_space<vmem>>, vector<24x8xf32>
    tpu.vector_store %arg10[%c24_65, %c24_66], %200 {strides = array<i32>} : memref<48x32xf32, #tpu.memory_space<vmem>>, vector<24x8xf32>,
    %c0_67 = arith.constant 0 : index
    %c0_68 = arith.constant 0 : index
    %202 = vector.load %arg10[%c0_67, %c0_68] : memref<48x32xf32, #tpu.memory_space<vmem>>, vector<48x32xf32>
    %203 = arith.truncf %202 : vector<48x32xf32> to vector<48x32xbf16>
    %c0_69 = arith.constant 0 : index
    %c0_70 = arith.constant 0 : index
    %c0_71 = arith.constant 0 : index
    %204 = vector.load %arg5[%c0_69, %c0_70, %c0_71] : memref<1x32x32xbf16, #tpu.memory_space<vmem>>, vector<1x32x32xbf16>
    %205 = vector.shape_cast %204 : vector<1x32x32xbf16> to vector<32x32xbf16>
    %cst_72 = arith.constant dense<0.000000e+00> : vector<48x32xf32>
    %206 = tpu.matmul %203, %205, %cst_72 {dimension_numbers = #tpu.dot_dimension_numbers<[1], [0], [0], [1], [0, 0, 1, 1], [], []>} : vector<48x32xbf16>, vector<32x32xbf16>, vector<48x32xf32> -> vector<48x32xf32>
    %207 = arith.addf %3, %206 : vector<48x32xf32>
    %208 = vector.broadcast %8 : vector<1x32xf32> to vector<48x32xf32>
    %209 = arith.addf %207, %208 : vector<48x32xf32>
    %cst_73 = arith.constant dense<0.000000e+00> : vector<48xf32>
    %210 = vector.multi_reduction <add>, %209, %cst_73 [1] : vector<48x32xf32> to vector<48xf32>
    %211 = vector.shape_cast %210 : vector<48xf32> to vector<48x1xf32>
    %cst_74 = arith.constant 3.200000e+01 : f32
    %212 = vector.broadcast %cst_74 : f32 to vector<48x1xf32>
    %213 = arith.divf %211, %212 : vector<48x1xf32>
    %214 = vector.broadcast %213 : vector<48x1xf32> to vector<48x32xf32>
    %215 = arith.subf %209, %214 : vector<48x32xf32>
    %216 = arith.mulf %215, %215 : vector<48x32xf32>
    %cst_75 = arith.constant dense<0.000000e+00> : vector<48xf32>
    %217 = vector.multi_reduction <add>, %216, %cst_75 [1] : vector<48x32xf32> to vector<48xf32>
    %218 = vector.shape_cast %217 : vector<48xf32> to vector<48x1xf32>
    %cst_76 = arith.constant 3.200000e+01 : f32
    %219 = vector.broadcast %cst_76 : f32 to vector<48x1xf32>
    %220 = arith.divf %218, %219 : vector<48x1xf32>
    %221 = vector.broadcast %213 : vector<48x1xf32> to vector<48x32xf32>
    %222 = arith.subf %209, %221 : vector<48x32xf32>
    %cst_77 = arith.constant 9.99999974E-6 : f32
    %223 = vector.broadcast %cst_77 : f32 to vector<48x1xf32>
    %224 = arith.addf %220, %223 : vector<48x1xf32>
    %225 = math.rsqrt %224 : vector<48x1xf32>
    %226 = vector.broadcast %225 : vector<48x1xf32> to vector<48x32xf32>
    %227 = arith.mulf %222, %226 : vector<48x32xf32>
    %228 = vector.broadcast %9 : vector<1x32xf32> to vector<48x32xf32>
    %229 = arith.mulf %227, %228 : vector<48x32xf32>
    %230 = vector.broadcast %10 : vector<1x32xf32> to vector<48x32xf32>
    %231 = arith.addf %229, %230 : vector<48x32xf32>
    %232 = arith.truncf %231 : vector<48x32xf32> to vector<48x32xbf16>
    %c0_78 = arith.constant 0 : index
    %c0_79 = arith.constant 0 : index
    %c0_80 = arith.constant 0 : index
    %233 = vector.load %arg6[%c0_78, %c0_79, %c0_80] : memref<1x32x64xbf16, #tpu.memory_space<vmem>>, vector<1x32x64xbf16>
    %234 = vector.shape_cast %233 : vector<1x32x64xbf16> to vector<32x64xbf16>
    %cst_81 = arith.constant dense<0.000000e+00> : vector<48x64xf32>
    %235 = tpu.matmul %232, %234, %cst_81 {dimension_numbers = #tpu.dot_dimension_numbers<[1], [0], [0], [1], [0, 0, 1, 1], [], []>} : vector<48x32xbf16>, vector<32x64xbf16>, vector<48x64xf32> -> vector<48x64xf32>
    %236 = vector.broadcast %12 : vector<1x64xf32> to vector<48x64xf32>
    %237 = arith.addf %235, %236 : vector<48x64xf32>
    %cst_82 = arith.constant 5.000000e-01 : f32
    %238 = vector.broadcast %cst_82 : f32 to vector<48x64xf32>
    %239 = arith.mulf %238, %237 : vector<48x64xf32>
    %cst_83 = arith.constant 4.471500e-02 : f32
    %240 = vector.broadcast %cst_83 : f32 to vector<48x64xf32>
    %241 = arith.mulf %240, %237 : vector<48x64xf32>
    %242 = arith.mulf %241, %237 : vector<48x64xf32>
    %243 = arith.mulf %242, %237 : vector<48x64xf32>
    %244 = arith.addf %237, %243 : vector<48x64xf32>
    %cst_84 = arith.constant 0.797884583 : f32
    %245 = vector.broadcast %cst_84 : f32 to vector<48x64xf32>
    %246 = arith.mulf %245, %244 : vector<48x64xf32>
    %247 = math.tanh %246 : vector<48x64xf32>
    %cst_85 = arith.constant 1.000000e+00 : f32
    %248 = vector.broadcast %cst_85 : f32 to vector<48x64xf32>
    %249 = arith.addf %248, %247 : vector<48x64xf32>
    %250 = arith.mulf %239, %249 : vector<48x64xf32>
    %251 = arith.truncf %250 : vector<48x64xf32> to vector<48x64xbf16>
    %c0_86 = arith.constant 0 : index
    %c0_87 = arith.constant 0 : index
    %c0_88 = arith.constant 0 : index
    %252 = vector.load %arg7[%c0_86, %c0_87, %c0_88] : memref<1x64x32xbf16, #tpu.memory_space<vmem>>, vector<1x64x32xbf16>
    %253 = vector.shape_cast %252 : vector<1x64x32xbf16> to vector<64x32xbf16>
    %cst_89 = arith.constant dense<0.000000e+00> : vector<48x32xf32>
    %254 = tpu.matmul %251, %253, %cst_89 {dimension_numbers = #tpu.dot_dimension_numbers<[1], [0], [0], [1], [0, 0, 1, 1], [], []>} : vector<48x64xbf16>, vector<64x32xbf16>, vector<48x32xf32> -> vector<48x32xf32>
    %255 = vector.broadcast %11 : vector<1x32xf32> to vector<48x32xf32>
    %256 = arith.addf %254, %255 : vector<48x32xf32>
    %257 = arith.addf %209, %256 : vector<48x32xf32>
    %c0_90 = arith.constant 0 : index
    %c0_91 = arith.constant 0 : index
    %258 = vector.load %arg9[%c0_90, %c0_91] : memref<48x32xf32, #tpu.memory_space<vmem>>, vector<48x32xf32>
    tpu.vector_store %arg9[%c0_90, %c0_91], %257 {strides = array<i32>} : memref<48x32xf32, #tpu.memory_space<vmem>>, vector<48x32xf32>,
    %c1_i32 = arith.constant 1 : i32
    %259 = arith.cmpi eq, %arg1, %c1_i32 : i32
    %260 = arith.extui %259 : i1 to i32
    %c0_i32_92 = arith.constant 0 : i32
    %261 = arith.cmpi ne, %260, %c0_i32_92 : i32
    scf.if %261 {
      %c0_93 = arith.constant 0 : index
      %c0_94 = arith.constant 0 : index
      %c0_95 = arith.constant 0 : index
      %262 = vector.load %arg8[%c0_93, %c0_94, %c0_95] : memref<1x48x32xf32, #tpu.memory_space<vmem>>, vector<1x48x32xf32>
      %263 = vector.shape_cast %262 : vector<1x48x32xf32> to vector<48x32xf32>
      %264 = vector.shape_cast %257 : vector<48x32xf32> to vector<1x48x32xf32>
      tpu.vector_store %arg8[%c0_93, %c0_94, %c0_95], %264 {strides = array<i32>} : memref<1x48x32xf32, #tpu.memory_space<vmem>>, vector<1x48x32xf32>,
    } else {
    }
    return
  }
  func.func @transform_0(%arg0: i32, %arg1: i32) -> (i32, i32, i32) {
    %c0_i32 = arith.constant 0 : i32
    %c0_i32_0 = arith.constant 0 : i32
    %c0_i32_1 = arith.constant 0 : i32
    return %arg0, %c0_i32, %c0_i32_0 : i32, i32, i32
  }
  func.func @transform_1(%arg0: i32, %arg1: i32) -> (i32, i32, i32) {
    %c0_i32 = arith.constant 0 : i32
    %c0_i32_0 = arith.constant 0 : i32
    %c0_i32_1 = arith.constant 0 : i32
    return %arg1, %c0_i32, %c0_i32_0 : i32, i32, i32
  }
  func.func @transform_2(%arg0: i32, %arg1: i32) -> (i32, i32, i32) {
    %c0_i32 = arith.constant 0 : i32
    %c0_i32_0 = arith.constant 0 : i32
    %c0_i32_1 = arith.constant 0 : i32
    return %arg1, %c0_i32, %c0_i32_0 : i32, i32, i32
  }
  func.func @transform_3(%arg0: i32, %arg1: i32) -> (i32, i32, i32) {
    %c0_i32 = arith.constant 0 : i32
    %c0_i32_0 = arith.constant 0 : i32
    %c0_i32_1 = arith.constant 0 : i32
    return %arg1, %c0_i32, %c0_i32_0 : i32, i32, i32
  }
  func.func @transform_4(%arg0: i32, %arg1: i32) -> (i32, i32, i32) {
    %c0_i32 = arith.constant 0 : i32
    %c0_i32_0 = arith.constant 0 : i32
    %c0_i32_1 = arith.constant 0 : i32
    return %arg1, %c0_i32, %c0_i32_0 : i32, i32, i32
  }
  func.func @transform_5(%arg0: i32, %arg1: i32) -> (i32, i32, i32) {
    %c0_i32 = arith.constant 0 : i32
    %c0_i32_0 = arith.constant 0 : i32
    %c0_i32_1 = arith.constant 0 : i32
    return %arg1, %c0_i32, %c0_i32_0 : i32, i32, i32
  }
  func.func @transform_6(%arg0: i32, %arg1: i32) -> (i32, i32, i32) {
    %c0_i32 = arith.constant 0 : i32
    %c0_i32_0 = arith.constant 0 : i32
    %c0_i32_1 = arith.constant 0 : i32
    return %arg0, %c0_i32, %c0_i32_0 : i32, i32, i32
  }
}

</mosaic_0001>

<bundles_post_ra>
// kernel: vit_forward.1
= control target key start
LH: loop header
LB: loop body
LE: loop exit
PB: predicated region body
PF: predicated region fallthrough
CT: control target
= control target key end

     0   :  { %s3320_s21 = smov 0   ;;  %s3322_s22 = smov 0   ;;  %s4130_s0 = inlined_call_operand.vmem [shape: f32[2,48,32], index: 0, kind: input, shape index: {}, may-alias: {0,6}]   ;;  %s4131_s1 = inlined_call_operand.vmem [shape: f32[2,8,128], index: 1, kind: input, shape index: {}]   ;;  %s4132_s2 = inlined_call_operand.vmem [shape: bf16[2,32,96], index: 2, kind: input, shape index: {}]   ;;  %s4133_s3 = inlined_call_operand.vmem [shape: bf16[2,32,32], index: 3, kind: input, shape index: {}]   ;;  %s4134_s4 = inlined_call_operand.vmem [shape: bf16[2,32,64], index: 4, kind: input, shape index: {}]   ;;  %s4135_s5 = inlined_call_operand.vmem [shape: bf16[2,64,32], index: 5, kind: input, shape index: {}]   ;;  %s4136_s6 = inlined_call_operand.vmem [shape: f32[2,48,32], index: 6, kind: output, shape index: {}, may-alias: {0,6}]  }
   0x1   :  { %4137 = sst [smem:[#allocation4_spill]] %s4130_s0  ;;  %s3324_s23 = smov 0  }
   0x2   :  { %s3326_s24 = smov 0   ;;  %s3328_s25 = smov 0  }
   0x3 LB: > { %s25_s26 = sadd.s32 1, %s3259_s23  ;;  %s28_s27 = sadd.s32 1, %s3263_s24  ;;  %s3267_s25 = sphi %s3328_s25, %s16_s25   ;;  %s3263_s24 = sphi %s3326_s24, %s4142_s24   ;;  %s3259_s23 = sphi %s3324_s23, %s4141_s23   ;;  %s3255_s22 = sphi %s3322_s22, %s4140_s22   ;;  %s3251_s21 = sphi %s3320_s21, %s4139_s21  }
   0x4   : > { %p26_p0 = scmp.ge.s32.totalorder %s25_s26, 2  ;;  %p2643_p1 = scmp.ge.s32.totalorder %s3267_s25, 1 }
   0x5   : > { %p273_p2 = scmp.lt.s32.totalorder %s3267_s25, 5 }
   0x6   : > { %s4144_s26 = smov (%p26_p0, %s25_s26), 0  ;;  %s4146_s27 = smov (!%p26_p0, %s28_s27), %s3263_s24 }
   0x7   : > { %p274_p3 = pnand %p2643_p1, %p273_p2  ;;  %p30_p4 = scmp.ge.s32.totalorder %s4146_s27, 2 }
   0x8   : > { %p327_p5 = scmp.lt.s32.totalorder (!%p274_p3), %s3255_s22, 1  ;;  %p332_p6 = scmp.lt.s32.totalorder (!%p274_p3), %s3251_s21, 1 }
   0x9   : > { %s4148_s27 = smov (%p30_p4, %s4146_s27), 0  ;;  %277 = sbr.rel (%p274_p3) target bundleno = 4448 (0x1160), region = 44 }
   0xa   : > { %s4138_s0 = sld [smem:[#allocation4_spill]] (!%p274_p3)  ;;  %p2655_p7 = scmp.ne.s32.totalorder (!%p274_p3), %s3251_s21, 0 }
  0x10   : > { %s4150_s22 = smov (!%p327_p5, %s3255_s22), 1  ;;  %vm372_vm0 = vcmask (!%p2655_p7), 261120  }
  0x11   : > { %s333_s28 = scalar_select %p332_p6, %s3251_s21, 1 }
  0x12   : > { %s3023_s29 = smul.u32 48, %s4150_s22 }
  0x13   : > { %s2645_s30 = sshll.u32 %s333_s28, 3  ;;  %s2713_s7 = sshll.u32 %s333_s28, 4 }
  0x14   : > { %s331_s10 = scalar_lea.vmem %s4138_s0, %s3023_s29  ;;  %s3360_s13 = scalar_lea.vmem %s4131_s1, %s2645_s30 }
  0x15   : > { %s3365_s16 = scalar_lea.vmem %s4132_s2, %s2713_s7  ;;  %s3370_s19 = scalar_lea.vmem %s4133_s3, %s2713_s7  ;;  %v366_v0 = vld [vmem:[%s331_s10] sm:$0xff] (!%p2655_p7)  ;;  %v367_v1 = vld [vmem:[%s331_s10 + $0x8] sm:$0xff] (!%p2655_p7)  ;;  %v368_v2 = vld [vmem:[%s331_s10 + $0x10] sm:$0xff] (!%p2655_p7) }
  0x16   : > { %s3375_s8 = scalar_lea.vmem %s4134_s4, %s2713_s7  ;;  %s2716_s9 = sshll.u32 %s333_s28, 5  ;;  %373 = vst.msk [vmem:[#allocation2] sm:$0xff] (!%p2655_p7), %vm372_vm0, %v366_v0  ;;  %374 = vst.msk [vmem:[#allocation2 + $0x8] sm:$0xff] (!%p2655_p7), %vm372_vm0, %v367_v1  ;;  %v369_v3 = vld [vmem:[%s331_s10 + $0x18] sm:$0xff] (!%p2655_p7)  ;;  %v370_v4 = vld [vmem:[%s331_s10 + $0x20] sm:$0xff] (!%p2655_p7) }
  0x17   : > { %s3380_s30 = scalar_lea.vmem %s4135_s5, %s2716_s9  ;;  %s3385_s15 = scalar_lea.vmem %s4136_s6, %s3023_s29  ;;  %375 = vst.msk [vmem:[#allocation2 + $0x10] sm:$0xff] (!%p2655_p7), %vm372_vm0, %v368_v2  ;;  %v371_v5 = vld [vmem:[%s331_s10 + $0x28] sm:$0xff] (!%p2655_p7)  ;;  %376 = vst.msk [vmem:[#allocation2 + $0x18] sm:$0xff] (!%p2655_p7), %vm372_vm0, %v369_v3 }
  0x18   : > { %365 = sbr.rel (%p2655_p7) target bundleno = 31 (0x1f), region = 48  ;;  %377 = vst.msk [vmem:[#allocation2 + $0x20] sm:$0xff] (!%p2655_p7), %vm372_vm0, %v370_v4  ;;  %378 = vst.msk [vmem:[#allocation2 + $0x28] sm:$0xff] (!%p2655_p7), %vm372_vm0, %v371_v5 }
  0x1f PF: > { %v379_v6 = vld [vmem:[#allocation2] sm:$0xff]  ;;  %vm386_vm1 = vcmask 261120   ;;  %v381_v7 = vld [vmem:[#allocation2 + $0x10] sm:$0xff]  ;;  %v380_v8 = vld [vmem:[#allocation2 + $0x8] sm:$0xff]  ;;  %v3269_v38 = vmov 0.0   ;;  %vm3270_vm2 = vmmov 0   ;;  %v466_v46 = vlaneseq }
  0x20   : > { %v387_v9 = vsel %vm386_vm1, %v379_v6, 0.0  ;;  %v393_v10 = vsel %vm386_vm1, %v381_v7, 0.0  ;;  %v382_v11 = vld [vmem:[#allocation2 + $0x18] sm:$0xff]  ;;  %v390_v12 = vsel %vm386_vm1, %v380_v8, 0.0  ;;  %v383_v32 = vld [vmem:[#allocation2 + $0x20] sm:$0xff]  ;;  %v384_v36 = vld [vmem:[#allocation2 + $0x28] sm:$0xff]  ;;  %2803 = vmatprep.subr.bf16.mxu1 %v3269_v38  ;;  %2807 = vmatprep.mubr.msk.bf16.mxu1 %vm3270_vm2, %v3269_v38 }
  0x21   : > { %388 = vadd.xlane.f32.xlu0 %v387_v9  ;;  %394 = vadd.xlane.f32.xlu1 %v393_v10  ;;  %v396_v13 = vsel %vm386_vm1, %v382_v11, 0.0  ;;  %v399_v35 = vsel %vm386_vm1, %v383_v32, 0.0  ;;  %v402_v37 = vsel %vm386_vm1, %v384_v36, 0.0  ;;  %v3080_v39 = vld [vmem:[%s3365_s16] sm:$0xff]   ;;  %v3081_v40 = vld [vmem:[%s3365_s16 + $0x8] sm:$0xff]   ;;  %v3421_v53 = vshrl.u32 %v466_v46, 7 }
  0x22   : > { %2804 = vmatpush3.bf16.msra.mxu1 %v3080_v39  ;;  %v385_v62 = vld [vmem:[%s3360_s13] sm:$0xff]  ;;  %vm592_vm3 = vcmask 64512   ;;  %s3271_s0 = smov 88   ;;  %s3272_s28 = smov 96   ;;  %vm700_vm4 = vcmask 1043456   ;;  %vm656_vm6 = vcmask 195584  }
  0x23   : > { %2805 = vmatprep.subr.bf16.mxu1 %v3269_v38  ;;  %v468_v59 = vsub.s32 0, %v3421_v53  ;;  %v478_v4 = vsub.s32 1, %v3421_v53  ;;  %s3273_s29 = smov 120   ;;  %s3274_s7 = smov 112   ;;  %vm940_vm7 = vcmask 130112   ;;  %vm1124_vm8 = vcmask 195712  }
  0x24   : > { %s3275_s10 = smov 80   ;;  %s3276_s16 = smov 64   ;;  %vm1308_vm9 = vcmask 261312   ;;  %vm2424_vm10 = vcmask 523264  }
  0x25   : > { %391 = vadd.xlane.f32.xlu0 %v390_v12  ;;  %397 = vadd.xlane.f32.xlu1 %v396_v13  ;;  %v469_v3 = vrot.slane %v385_v62, %v468_v59  ;;  %v479_v10 = vrot.slane %v385_v62, %v478_v4  ;;  %s3277_s17 = smov 56   ;;  %s3278_s18 = smov 48  }
  0x26   : > { %2806 = vmatpush3.bf16.msra.mxu1 %v3081_v40  ;;  %s3279_s20 = smov 72   ;;  %s3280_s22 = smov 104  }
  0x27   : > { %s3281_s9 = smov 40   ;;  %s3282_s11 = smov 8  }
  0x28   : > { %s3283_s12 = smov 16   ;;  %s3284_s14 = smov 24  }
  0x29   : > { %p2710_p8 = scmp.ne.s32.totalorder %s3251_s21, 1 }
  0xae   : > { %v389_v14 = vpop.xlane.xlu0 %388  ;;  %v395_v15 = vpop.xlane.xlu1 %394 }
  0xaf   : > { %v406_v16 = vmul.f32 0.03125, %v389_v14  ;;  %v408_v17 = vmul.f32 0.03125, %v395_v15 }
  0xb1   : > { %v3392_v18 = vsub.f32 %v379_v6, %v406_v16  ;;  %v3394_v19 = vsub.f32 %v381_v7, %v408_v17 }
  0xb2   : > { %v392_v20 = vpop.xlane.xlu0 %391  ;;  %v398_v21 = vpop.xlane.xlu1 %397 }
  0xb3   : > { %v407_v22 = vmul.f32 0.03125, %v392_v20  ;;  %v409_v23 = vmul.f32 0.03125, %v398_v21  ;;  %v418_v24 = vmul.f32 %v3392_v18, %v3392_v18  ;;  %v420_v25 = vmul.f32 %v3394_v19, %v3394_v19 }
  0xb5   : > { %v3400_v26 = vsub.f32 %v380_v8, %v407_v22  ;;  %v3402_v27 = vsub.f32 %v382_v11, %v409_v23  ;;  %v424_v28 = vsel %vm386_vm1, %v418_v24, 0.0  ;;  %v430_v29 = vsel %vm386_vm1, %v420_v25, 0.0 }
  0xb6   : > { %425 = vadd.xlane.f32.xlu0 %v424_v28 }
  0xb7   : > { %v419_v30 = vmul.f32 %v3400_v26, %v3400_v26  ;;  %v421_v31 = vmul.f32 %v3402_v27, %v3402_v27 }
  0xb9   : > { %v427_v33 = vsel %vm386_vm1, %v419_v30, 0.0  ;;  %v433_v34 = vsel %vm386_vm1, %v421_v31, 0.0 }
  0xba   : > { %431 = vadd.xlane.f32.xlu0 %v430_v29  ;;  %428 = vadd.xlane.f32.xlu1 %v427_v33 }
  0xbe   : > { %434 = vadd.xlane.f32.xlu1 %v433_v34  ;;  %400 = vadd.xlane.f32.xlu0 %v399_v35 }
  0xc2   : > { %403 = vadd.xlane.f32.xlu1 %v402_v37 }
 0x143   : > { %v426_v41 = vpop.xlane.xlu0 %425 }
 0x144   : > { %v442_v42 = vmul.f32 0.03125, %v426_v41 }
 0x146   : > { %v448_v43 = vadd.f32 1e-05, %v442_v42 }
 0x147   : > { %v429_v44 = vpop.xlane.xlu1 %428  ;;  %v432_v45 = vpop.xlane.xlu0 %431 }
 0x148   : > { %3090 = vrsqrt.f32 %v448_v43  ;;  %v443_v47 = vmul.f32 0.03125, %v429_v44  ;;  %v444_v48 = vmul.f32 0.03125, %v432_v45 }
 0x14a   : > { %v449_v49 = vadd.f32 1e-05, %v443_v47  ;;  %v450_v50 = vadd.f32 1e-05, %v444_v48 }
 0x14b   : > { %v435_v51 = vpop.xlane.xlu1 %434  ;;  %v401_v52 = vpop.xlane.xlu0 %400 }
 0x14c   : > { %3092 = vrsqrt.f32 %v449_v49  ;;  %v445_v54 = vmul.f32 0.03125, %v435_v51  ;;  %v410_v55 = vmul.f32 0.03125, %v401_v52 }
 0x14d   : > { %3094 = vrsqrt.f32 %v450_v50 }
 0x14e   : > { %v451_v56 = vadd.f32 1e-05, %v445_v54  ;;  %v416_v57 = vsub.f32 %v383_v32, %v410_v55 }
 0x14f   : > { %v404_v58 = vpop.xlane.xlu1 %403 }
 0x150   : > { %3096 = vrsqrt.f32 %v451_v56  ;;  %v411_v60 = vmul.f32 0.03125, %v404_v58  ;;  %v422_v61 = vmul.f32 %v416_v57, %v416_v57 }
 0x152   : > { %v3091_v63 = vpop.eup %3090  ;;  %v417_v0 = vsub.f32 %v384_v36, %v411_v60  ;;  %v436_v1 = vsel %vm386_vm1, %v422_v61, 0.0 }
 0x153   : > { %437 = vadd.xlane.f32.xlu0 %v436_v1  ;;  %v460_v2 = vmul.f32 %v3091_v63, %v3392_v18 }
 0x154   : > { %v423_v5 = vmul.f32 %v417_v0, %v417_v0 }
 0x155   : > { %v470_v9 = vmul.f32 %v469_v3, %v460_v2 }
 0x156   : > { %v3093_v6 = vpop.eup %3092  ;;  %v439_v7 = vsel %vm386_vm1, %v423_v5, 0.0 }
 0x157   : > { %440 = vadd.xlane.f32.xlu1 %v439_v7  ;;  %v461_v8 = vmul.f32 %v3093_v6, %v3400_v26  ;;  %v3095_v11 = vpop.eup %3094  ;;  %v480_v14 = vadd.f32 %v479_v10, %v470_v9 }
 0x158   : > { %v462_v16 = vmul.f32 %v3095_v11, %v3394_v19 }
 0x159   : > { %v471_v12 = vmul.f32 %v469_v3, %v461_v8 }
 0x15a   : > { %v3097_v13 = vpop.eup %3096  ;;  %v472_v21 = vmul.f32 %v469_v3, %v462_v16 }
 0x15b   : > { %v481_v15 = vadd.f32 %v479_v10, %v471_v12  ;;  %v463_v17 = vmul.f32 %v3097_v13, %v3402_v27 }
 0x15c   : > { %v482_v23 = vadd.f32 %v479_v10, %v472_v21 }
 0x15d   : > { %v486_v18 = vpack.c.bf16 %v481_v15, %v480_v14  ;;  %v473_v20 = vmul.f32 %v469_v3, %v463_v17 }
 0x15f   : > { %2808 = vmatmul.mubr.msk.bf16.vlgmr.msra.gmra.mrb[0].mxu1 %vm386_vm1, %v486_v18  ;;  %v483_v22 = vadd.f32 %v479_v10, %v473_v20 }
 0x160   : > { %2811 = vmatprep.mubr.msk.bf16.mxu1 %vm3270_vm2, %v3269_v38 }
 0x161   : > { %v487_v24 = vpack.c.bf16 %v483_v22, %v482_v23  ;;  %v3515_v23 = vand.u32 127, %v466_v46 }
 0x163   : > { %vm585_vm5 = vcmp.lt.s32.totalorder %v3515_v23, 19 }
 0x167   : > { %2812 = vmatmul.mubr.msk.bf16.gmra.mrb[4].mxu1 %vm386_vm1, %v487_v24 }
 0x168   : > { %2815 = vmatprep.mubr.msk.bf16.mxu1 %vm3270_vm2, %v3269_v38 }
 0x1e0   : > { %v438_v25 = vpop.xlane.xlu0 %437 }
 0x1e1   : > { %v446_v19 = vmul.f32 0.03125, %v438_v25 }
 0x1e3   : > { %v452_v26 = vadd.f32 1e-05, %v446_v19 }
 0x1e4   : > { %v441_v27 = vpop.xlane.xlu1 %440 }
 0x1e5   : > { %v447_v28 = vmul.f32 0.03125, %v441_v27  ;;  %3098 = vrsqrt.f32 %v452_v26 }
 0x1e7   : > { %v453_v29 = vadd.f32 1e-05, %v447_v28 }
 0x1e9   : > { %3100 = vrsqrt.f32 %v453_v29 }
 0x1ef   : > { %v3099_v30 = vpop.eup %3098 }
 0x1f0   : > { %v464_v31 = vmul.f32 %v3099_v30, %v416_v57 }
 0x1f2   : > { %v474_v32 = vmul.f32 %v469_v3, %v464_v31 }
 0x1f3   : > { %v3101_v33 = vpop.eup %3100 }
 0x1f4   : > { %v465_v34 = vmul.f32 %v3101_v33, %v417_v0  ;;  %v484_v36 = vadd.f32 %v479_v10, %v474_v32 }
 0x1f6   : > { %v475_v35 = vmul.f32 %v469_v3, %v465_v34 }
 0x1f8   : > { %v485_v37 = vadd.f32 %v479_v10, %v475_v35 }
 0x1fa   : > { %v488_v39 = vpack.c.bf16 %v485_v37, %v484_v36 }
 0x1fc   : > { %2816 = vmatmul.mubr.msk.bf16.gmra.mrb[8].mxu1 %vm386_vm1, %v488_v39 }
 0x232   : > { %v548_v40 = vpop.f32.mrb[0].mxu1 }
 0x233   : > { %v2809_v41 = vpop.f32.mrb[1].mxu1  ;;  %v571_v43 = vmul.f32 0.35355338, %v548_v40 }
 0x234   : > { %v551_v42 = vpop.f32.mrb[2].mxu1 }
 0x235   : > { %v572_v44 = vmul.f32 0.35355338, %v551_v42  ;;  %v3439_v45 = vpack.c.bf16 %v551_v42, %v548_v40  ;;  %v2810_v47 = vpop.f32.mrb[3].mxu1 }
 0x237   : > { %v3441_v48 = vpack.c.bf16 %v572_v44, %v571_v43  ;;  %764 = vrot.lane.b32.xlu1 %v3439_v45, %s3271_s0  ;;  %588 = vrot.lane.b32.xlu0 %v3439_v45, %s3272_s28 }
 0x239   : > { %2823 = vmatprep.mubr.msk.bf16.mxu1 %vm592_vm3, %v3441_v48 }
 0x23a   : > { %v556_v49 = vpop.f32.mrb[4].mxu1 }
 0x23b   : > { %v2813_v50 = vpop.f32.mrb[5].mxu1  ;;  %760 = vrot.lane.b32.xlu0 %v3441_v48, %s3273_s29  ;;  %v573_v52 = vmul.f32 0.35355338, %v556_v49 }
 0x23c   : > { %v559_v51 = vpop.f32.mrb[6].mxu1 }
 0x23d   : > { %v574_v54 = vmul.f32 0.35355338, %v559_v51  ;;  %v3451_v55 = vpack.c.bf16 %v559_v51, %v556_v49  ;;  %v2814_v56 = vpop.f32.mrb[7].mxu1 }
 0x23f   : > { %v3453_v57 = vpack.c.bf16 %v574_v54, %v573_v52  ;;  %590 = vrot.lane.b32.xlu1 %v3451_v55, %s3272_s28 }
 0x241   : > { %762 = vrot.lane.b32.xlu0 %v3453_v57, %s3273_s29 }
 0x243   : > { %766 = vrot.lane.b32.xlu1 %v3451_v55, %s3271_s0 }
 0x245   : > { %944 = vrot.lane.b32.xlu0 %v3441_v48, %s3274_s7 }
 0x247   : > { %948 = vrot.lane.b32.xlu1 %v3439_v45, %s3275_s10 }
 0x249   : > { %691 = vrot.lane.b32.xlu0 %v3451_v55, %s3276_s16 }
 0x24b   : > { %950 = vrot.lane.b32.xlu1 %v3451_v55, %s3275_s10 }
 0x24f   : > { %946 = vrot.lane.b32.xlu1 %v3453_v57, %s3274_s7 }
 0x253   : > { %689 = vrot.lane.b32.xlu1 %v3439_v45, %s3276_s16 }
 0x257   : > { %863 = vrot.lane.b32.xlu1 %v3439_v45, %s3277_s17 }
 0x25b   : > { %865 = vrot.lane.b32.xlu1 %v3451_v55, %s3277_s17 }
 0x2a9   : > { %v765_v58 = vpop.permute.xlu1 %764  ;;  %v589_v59 = vpop.permute.xlu0 %588 }
 0x2aa   : > { %2999 = vmatprep.subr.msk.bf16.mxu1 %vm592_vm3, %v589_v59  ;;  %3002 = vmatprep.subr.msk.bf16.mxu0 %vm592_vm3, %v765_v58  ;;  %v600_v60 = vsel %vm592_vm3, %v589_v59, 0  ;;  %v775_v61 = vsel %vm592_vm3, %v765_v58, 0 }
 0x2ab   : > { %2820 = vmatpush3.bf16.xpose.msra.mxu1 %v600_v60  ;;  %2836 = vmatpush3.bf16.xpose.msra.mxu0 %v775_v61 }
 0x2ad   : > { %v761_v62 = vpop.permute.xlu0 %760 }
 0x2ae   : > { %2839 = vmatprep.mubr.msk.bf16.mxu0 %vm592_vm3, %v761_v62 }
 0x2b1   : > { %v591_v63 = vpop.permute.xlu1 %590 }
 0x2b2   : > { %3000 = vmatprep.subr.msk.bf16.mxu1 %vm592_vm3, %v591_v63  ;;  %v603_v0 = vsel %vm592_vm3, %v591_v63, 0 }
 0x2b3   : > { %2822 = vmatpush3.bf16.xpose.msra.mxu1 %v603_v0  ;;  %v763_v3 = vpop.permute.xlu0 %762 }
 0x2b5   : > { %v767_v1 = vpop.permute.xlu1 %766 }
 0x2b6   : > { %3003 = vmatprep.subr.msk.bf16.mxu0 %vm592_vm3, %v767_v1  ;;  %v778_v2 = vsel %vm592_vm3, %v767_v1, 0 }
 0x2b7   : > { %2838 = vmatpush3.bf16.xpose.msra.mxu0 %v778_v2  ;;  %v945_v6 = vpop.permute.xlu0 %944 }
 0x2b9   : > { %v949_v4 = vpop.permute.xlu1 %948 }
 0x2ba   : > { %2824 = vmatmul.mubr.msk.bf16.vlgmr.msra.gmra.mrb[12].mxu1 %vm592_vm3, %v3453_v57  ;;  %3005 = vmatprep.subr.msk.bf16.mxu0 %vm592_vm3, %v949_v4  ;;  %v959_v7 = vsel %vm592_vm3, %v949_v4, 0 }
 0x2bb   : > { %v692_v11 = vpop.permute.xlu0 %691 }
 0x2bc   : > { %v702_v12 = vsel %vm700_vm4, %v692_v11, 0 }
 0x2bd   : > { %v951_v5 = vpop.permute.xlu1 %950 }
 0x2be   : > { %2840 = vmatmul.mubr.msk.bf16.vlgmr.msra.gmra.mrb[0].mxu0 %vm592_vm3, %v763_v3  ;;  %v962_v10 = vsel %vm592_vm3, %v951_v5, 0 }
 0x2bf   : > { %2852 = vmatpush3.bf16.xpose.msra.mxu0 %v959_v7  ;;  %2855 = vmatprep.mubr.msk.bf16.mxu0 %vm592_vm3, %v945_v6 }
 0x2c0   : > { %3006 = vmatprep.subr.msk.bf16.mxu0 %vm592_vm3, %v951_v5 }
 0x2c1   : > { %v947_v8 = vpop.permute.xlu1 %946 }
 0x2c5   : > { %v690_v9 = vpop.permute.xlu1 %689 }
 0x2c6   : > { %2827 = vmatprep.subr.bf16.mxu1 %v690_v9 }
 0x2c7   : > { %2828 = vmatpush3.bf16.msra.mxu1 %v690_v9  ;;  %2854 = vmatpush3.bf16.xpose.msra.mxu0 %v962_v10 }
 0x2c8   : > { %3001 = vmatprep.subr.msk.bf16.mxu1 %vm700_vm4, %v692_v11 }
 0x2c9   : > { %v3496_v13 = vpop.permute.xlu1 %863 }
 0x2cb   : > { %2830 = vmatpush3.bf16.msra.mxu1 %v702_v12 }
 0x2cc   : > { %2843 = vmatprep.subr.bf16.mxu1 %v3496_v13 }
 0x2cd   : > { %v866_v59 = vpop.permute.xlu1 %865 }
 0x2ce   : > { %2856 = vmatmul.mubr.msk.bf16.vlgmr.msra.gmra.mrb[4].mxu0 %vm592_vm3, %v947_v8 }
 0x2cf   : > { %v3500_v14 = vpop.f32.mrb[8].mxu1 }
 0x2d0   : > { %v3503_v15 = vmul.f32 0.35355338, %v3500_v14  ;;  %v2817_v16 = vpop.f32.mrb[9].mxu1 }
 0x2d1   : > { %v3505_v17 = vpop.f32.mrb[10].mxu1 }
 0x2d2   : > { %v3508_v18 = vmul.f32 0.35355338, %v3505_v17  ;;  %v582_v20 = vpack.c.bf16 %v3505_v17, %v3500_v14  ;;  %v2818_v21 = vpop.f32.mrb[11].mxu1 }
 0x2d4   : > { %v579_v22 = vpack.c.bf16 %v3508_v18, %v3503_v15 }
 0x38d   : > { %v2825_v24 = vpop.f32.mrb[12].mxu1 }
 0x38e   : > { %v655_v25 = vsel %vm585_vm5, %v2825_v24, -1e+30  ;;  %v639_v19 = vpop.f32.mrb[13].mxu1 }
 0x38f   : > { %v2826_v26 = vpop.f32.mrb[14].mxu1  ;;  %v663_v27 = vsel %vm656_vm6, %v655_v25, -inf  ;;  %v653_v28 = vsel %vm585_vm5, %v639_v19, -1e+30 }
 0x390   : > { %664 = vmax.xlane.f32.xlu0 %v663_v27  ;;  %v642_v29 = vpop.f32.mrb[15].mxu1  ;;  %v657_v33 = vsel %vm656_vm6, %v653_v28, -inf }
 0x391   : > { %v2841_v30 = vpop.f32.mrb[0].mxu0  ;;  %v654_v35 = vsel %vm585_vm5, %v642_v29, -1e+30 }
 0x392   : > { %v830_v46 = vsel %vm585_vm5, %v2841_v30, -1e+30  ;;  %v814_v31 = vpop.f32.mrb[1].mxu0  ;;  %v660_v39 = vsel %vm656_vm6, %v654_v35, -inf }
 0x393   : > { %v2842_v32 = vpop.f32.mrb[2].mxu0  ;;  %v837_v34 = vsel %vm656_vm6, %v830_v46, -inf  ;;  %v828_v36 = vsel %vm585_vm5, %v814_v31, -1e+30  ;;  %v875_v31 = vsel %vm700_vm4, %v866_v59, 0 }
 0x394   : > { %658 = vmax.xlane.f32.xlu0 %v657_v33  ;;  %838 = vmax.xlane.f32.xlu1 %v837_v34  ;;  %v817_v37 = vpop.f32.mrb[3].mxu0  ;;  %v831_v40 = vsel %vm656_vm6, %v828_v36, -inf }
 0x395   : > { %v829_v41 = vsel %vm585_vm5, %v817_v37, -1e+30 }
 0x396   : > { %v834_v42 = vsel %vm656_vm6, %v829_v41, -inf }
 0x398   : > { %661 = vmax.xlane.f32.xlu1 %v660_v39  ;;  %832 = vmax.xlane.f32.xlu0 %v831_v40 }
 0x39c   : > { %835 = vmax.xlane.f32.xlu0 %v834_v42 }
 0x3a1   : > { %v2857_v43 = vpop.f32.mrb[4].mxu0 }
 0x3a2   : > { %v3538_v44 = vsel %vm585_vm5, %v2857_v43, -1e+30  ;;  %v998_v47 = vpop.f32.mrb[5].mxu0 }
 0x3a3   : > { %v2858_v49 = vpop.f32.mrb[6].mxu0  ;;  %v1021_v50 = vsel %vm656_vm6, %v3538_v44, -inf  ;;  %v3544_v51 = vsel %vm585_vm5, %v998_v47, -1e+30 }
 0x3a4   : > { %1022 = vmax.xlane.f32.xlu0 %v1021_v50  ;;  %v1001_v52 = vpop.f32.mrb[7].mxu0  ;;  %v1015_v54 = vsel %vm656_vm6, %v3544_v51, -inf }
 0x3a5   : > { %v3558_v56 = vsel %vm585_vm5, %v1001_v52, -1e+30 }
 0x3a6   : > { %v1018_v58 = vsel %vm656_vm6, %v3558_v56, -inf }
 0x3a8   : > { %1016 = vmax.xlane.f32.xlu0 %v1015_v54 }
 0x3a9   : > { %1047 = vrot.lane.b32.xlu1 %v3439_v45, %s3278_s18 }
 0x3be   : > { %1049 = vrot.lane.b32.xlu0 %v3451_v55, %s3278_s18 }
 0x3c2   : > { %1134 = vrot.lane.b32.xlu0 %v3451_v55, %s3279_s20 }
 0x3c6   : > { %1130 = vrot.lane.b32.xlu0 %v3453_v57, %s3280_s22 }
 0x3cd   : > { %1019 = vmax.xlane.f32.xlu1 %v1018_v58 }
 0x3de   : > { %1132 = vrot.lane.b32.xlu1 %v3439_v45, %s3279_s20 }
 0x3e2   : > { %1128 = vrot.lane.b32.xlu1 %v3441_v48, %s3280_s22 }
 0x41d   : > { %v665_v60 = vpop.xlane.xlu0 %664 }
 0x41e   : > { %v668_v61 = vsub.f32 %v655_v25, %v665_v60 }
 0x420   : > { %v673_v1 = vmul.f32 1.442695, %v668_v61 }
 0x421   : > { %v839_v62 = vpop.xlane.xlu1 %838  ;;  %v659_v63 = vpop.xlane.xlu0 %658 }
 0x422   : > { %v666_v0 = vsub.f32 %v653_v28, %v659_v63  ;;  %3102 = vpow2.f32 %v673_v1  ;;  %v842_v8 = vsub.f32 %v830_v46, %v839_v62 }
 0x424   : > { %v669_v2 = vmul.f32 1.442695, %v666_v0  ;;  %v847_v12 = vmul.f32 1.442695, %v842_v8 }
 0x425   : > { %v662_v3 = vpop.xlane.xlu1 %661  ;;  %v833_v4 = vpop.xlane.xlu0 %832 }
 0x426   : > { %v667_v5 = vsub.f32 %v654_v35, %v662_v3  ;;  %v840_v6 = vsub.f32 %v828_v36, %v833_v4  ;;  %3104 = vpow2.f32 %v669_v2 }
 0x428   : > { %v671_v7 = vmul.f32 1.442695, %v667_v5  ;;  %v843_v9 = vmul.f32 1.442695, %v840_v6 }
 0x429   : > { %v836_v10 = vpop.xlane.xlu0 %835  ;;  %v1048_v32 = vpop.permute.xlu1 %1047 }
 0x42a   : > { %3106 = vpow2.f32 %v671_v7  ;;  %v841_v48 = vsub.f32 %v829_v41, %v836_v10 }
 0x42b   : > { %3108 = vpow2.f32 %v843_v9 }
 0x42c   : > { %v845_v11 = vmul.f32 1.442695, %v841_v48  ;;  %v3566_v16 = vpop.eup %3102 }
 0x42d   : > { %v688_v26 = vpack.c.bf16 %v3566_v16, %v3566_v16 }
 0x42e   : > { %3110 = vpow2.f32 %v845_v11 }
 0x42f   : > { %3112 = vpow2.f32 %v847_v12 }
 0x430   : > { %v3568_v21 = vpop.eup %3104 }
 0x431   : > { %v1023_v25 = vpop.xlane.xlu0 %1022 }
 0x432   : > { %v1026_v35 = vsub.f32 %v3538_v44, %v1023_v25 }
 0x434   : > { %v3570_v24 = vpop.eup %3106  ;;  %v1031_v37 = vmul.f32 1.442695, %v1026_v35 }
 0x435   : > { %v687_v19 = vpack.c.bf16 %v3570_v24, %v3568_v21  ;;  %v3576_v27 = vpop.eup %3108  ;;  %v1017_v46 = vpop.xlane.xlu0 %1016 }
 0x436   : > { %v1024_v36 = vsub.f32 %v3544_v51, %v1017_v46  ;;  %3114 = vpow2.f32 %v1031_v37  ;;  %v3646_v46 = vrot.slane %v582_v20, 4 }
 0x437   : > { %2831 = vmatprep.mubr.msk.bf16.mxu1 %vm656_vm6, %v687_v19 }
 0x438   : > { %v3579_v28 = vpop.eup %3110  ;;  %2832 = vmatmul.mubr.msk.bf16.vlgmr.msra.gmra.mrb[16].mxu1 %vm656_vm6, %v688_v26  ;;  %v1027_v39 = vmul.f32 1.442695, %v1024_v36 }
 0x439   : > { %2844 = vmatpush3.bf16.msra.mxu1 %v3496_v13  ;;  %v861_v29 = vpack.c.bf16 %v3579_v28, %v3576_v27  ;;  %v3586_v30 = vpop.eup %3112  ;;  %v1050_v13 = vpop.permute.xlu0 %1049 }
 0x43a   : > { %3004 = vmatprep.subr.msk.bf16.mxu1 %vm700_vm4, %v866_v59  ;;  %v862_v33 = vpack.c.bf16 %v3586_v30, %v3586_v30  ;;  %v1059_v34 = vsel %vm700_vm4, %v1050_v13, 0  ;;  %3116 = vpow2.f32 %v1027_v39 }
 0x43b   : > { %2847 = vmatprep.mubr.msk.bf16.mxu1 %vm656_vm6, %v861_v29 }
 0x43d   : > { %2846 = vmatpush3.bf16.msra.mxu1 %v875_v31  ;;  %v1318_v31 = vrot.slane %v3451_v55, 4 }
 0x43e   : > { %2859 = vmatprep.subr.bf16.mxu1 %v1048_v32 }
 0x440   : > { %2848 = vmatmul.mubr.msk.bf16.vlgmr.msra.gmra.mrb[20].mxu1 %vm656_vm6, %v862_v33  ;;  %v3599_v47 = vpop.eup %3114 }
 0x441   : > { %2860 = vmatpush3.bf16.msra.mxu1 %v1048_v32  ;;  %v1046_v51 = vpack.c.bf16 %v3599_v47, %v3599_v47  ;;  %v3653_v32 = vsel %vm700_vm4, %v1318_v31, %v3646_v46 }
 0x442   : > { %3007 = vmatprep.subr.msk.bf16.mxu1 %vm700_vm4, %v1050_v13 }
 0x444   : > { %v3601_v49 = vpop.eup %3116 }
 0x445   : > { %2862 = vmatpush3.bf16.msra.mxu1 %v1059_v34 }
 0x45a   : > { %v1020_v40 = vpop.xlane.xlu1 %1019 }
 0x45b   : > { %v1025_v41 = vsub.f32 %v3558_v56, %v1020_v40  ;;  %v1135_v56 = vpop.permute.xlu0 %1134 }
 0x45c   : > { %v1146_v58 = vsel %vm592_vm3, %v1135_v56, 0 }
 0x45d   : > { %v1029_v42 = vmul.f32 1.442695, %v1025_v41 }
 0x45e   : > { %v1133_v43 = vpop.permute.xlu1 %1132 }
 0x45f   : > { %3118 = vpow2.f32 %v1029_v42  ;;  %3008 = vmatprep.subr.msk.bf16.mxu1 %vm592_vm3, %v1133_v43  ;;  %v1143_v52 = vsel %vm592_vm3, %v1133_v43, 0  ;;  %v1131_v59 = vpop.permute.xlu0 %1130 }
 0x462   : > { %v1129_v54 = vpop.permute.xlu1 %1128 }
 0x469   : > { %v3603_v50 = vpop.eup %3118 }
 0x46a   : > { %v1045_v44 = vpack.c.bf16 %v3603_v50, %v3601_v49  ;;  %v1036_v23 = vsel %vm656_vm6, %v3603_v50, 0.0  ;;  %v855_v50 = vsel %vm656_vm6, %v3586_v30, 0.0 }
 0x46c   : > { %2863 = vmatprep.mubr.msk.bf16.mxu1 %vm656_vm6, %v1045_v44  ;;  %v3675_v44 = vrot.slane %v579_v22, 4 }
 0x46d   : > { %2864 = vmatmul.mubr.msk.bf16.vlgmr.msra.gmra.mrb[24].mxu1 %vm656_vm6, %v1046_v51 }
 0x46e   : > { %2868 = vmatpush3.bf16.xpose.msra.mxu1 %v1143_v52  ;;  %2871 = vmatprep.mubr.msk.bf16.mxu1 %vm592_vm3, %v1129_v54  ;;  %v1314_v54 = vrot.slane %v3453_v57, 4 }
 0x46f   : > { %3009 = vmatprep.subr.msk.bf16.mxu1 %vm592_vm3, %v1135_v56 }
 0x476   : > { %2870 = vmatpush3.bf16.xpose.msra.mxu1 %v1146_v58  ;;  %v3687_v58 = vsel %vm700_vm4, %v1314_v54, %v3675_v44 }
 0x47d   : > { %2872 = vmatmul.mubr.msk.bf16.vlgmr.msra.gmra.mrb[28].mxu1 %vm592_vm3, %v1131_v59 }
 0x50b   : > { %v3616_v60 = vpop.f32.mrb[16].mxu1 }
 0x50c   : > { %v3618_v61 = vpop.f32.mrb[17].mxu1 }
 0x50d   : > { %v2834_v62 = vpop.f32.mrb[18].mxu1 }
 0x50e   : > { %v3620_v63 = vpop.f32.mrb[19].mxu1 }
 0x513   : > { %v3622_v0 = vpop.f32.mrb[20].mxu1 }
 0x514   : > { %v3624_v1 = vpop.f32.mrb[21].mxu1 }
 0x515   : > { %v2850_v2 = vpop.f32.mrb[22].mxu1 }
 0x516   : > { %v3626_v3 = vpop.f32.mrb[23].mxu1 }
 0x540   : > { %v3628_v4 = vpop.f32.mrb[24].mxu1 }
 0x541   : > { %v3630_v5 = vpop.f32.mrb[25].mxu1 }
 0x542   : > { %v2866_v6 = vpop.f32.mrb[26].mxu1 }
 0x543   : > { %v3632_v7 = vpop.f32.mrb[27].mxu1 }
 0x550   : > { %v2873_v8 = vpop.f32.mrb[28].mxu1 }
 0x551   : > { %v1198_v9 = vsel %vm585_vm5, %v2873_v8, -1e+30  ;;  %v1182_v10 = vpop.f32.mrb[29].mxu1 }
 0x552   : > { %v1196_v48 = vsel %vm585_vm5, %v1182_v10, -1e+30  ;;  %v2874_v11 = vpop.f32.mrb[30].mxu1  ;;  %v1205_v12 = vsel %vm656_vm6, %v1198_v9, -inf }
 0x553   : > { %1206 = vmax.xlane.f32.xlu0 %v1205_v12  ;;  %v1185_v25 = vpop.f32.mrb[31].mxu1  ;;  %v1199_v19 = vsel %vm656_vm6, %v1196_v48, -inf }
 0x554   : > { %v1197_v26 = vsel %vm585_vm5, %v1185_v25, -1e+30  ;;  %1200 = vmax.xlane.f32.xlu1 %v1199_v19 }
 0x555   : > { %v1202_v29 = vsel %vm656_vm6, %v1197_v26, -inf }
 0x557   : > { %1203 = vmax.xlane.f32.xlu0 %v1202_v29 }
 0x565   : > { %1233 = vrot.lane.b32.xlu1 %v3451_v55, %s3281_s9 }
 0x569   : > { %1321 = vrot.lane.b32.xlu1 %v3653_v32, %s3272_s28 }
 0x56d   : > { %1323 = vrot.lane.b32.xlu1 %v3646_v46, %s3272_s28  ;;  %1231 = vrot.lane.b32.xlu0 %v3439_v45, %s3281_s9 }
 0x571   : > { %1422 = vrot.lane.b32.xlu1 %v3646_v46, %s3276_s16 }
 0x5e0   : > { %v1207_v14 = vpop.xlane.xlu0 %1206 }
 0x5e1   : > { %v1210_v17 = vsub.f32 %v1198_v9, %v1207_v14  ;;  %v1201_v20 = vpop.xlane.xlu1 %1200 }
 0x5e2   : > { %v1208_v55 = vsub.f32 %v1196_v48, %v1201_v20 }
 0x5e3   : > { %v1215_v33 = vmul.f32 1.442695, %v1210_v17 }
 0x5e4   : > { %v1211_v13 = vmul.f32 1.442695, %v1208_v55  ;;  %v1204_v34 = vpop.xlane.xlu0 %1203 }
 0x5e5   : > { %v1209_v35 = vsub.f32 %v1197_v26, %v1204_v34  ;;  %3120 = vpow2.f32 %v1215_v33  ;;  %v1234_v37 = vpop.permute.xlu1 %1233 }
 0x5e6   : > { %3122 = vpow2.f32 %v1211_v13  ;;  %v1243_v45 = vsel %vm700_vm4, %v1234_v37, 0 }
 0x5e7   : > { %v1213_v36 = vmul.f32 1.442695, %v1209_v35 }
 0x5e8   : > { %v1232_v39 = vpop.permute.xlu0 %1231 }
 0x5e9   : > { %3124 = vpow2.f32 %v1213_v36  ;;  %2875 = vmatprep.subr.bf16.mxu0 %v1232_v39  ;;  %v1322_v40 = vpop.permute.xlu1 %1321 }
 0x5ea   : > { %2876 = vmatpush3.bf16.msra.mxu0 %v1232_v39  ;;  %v1332_v56 = vsel %vm592_vm3, %v1322_v40, 0 }
 0x5eb   : > { %3010 = vmatprep.subr.msk.bf16.mxu0 %vm700_vm4, %v1234_v37 }
 0x5ed   : > { %v1324_v15 = vpop.permute.xlu1 %1323 }
 0x5ee   : > { %2878 = vmatpush3.bf16.msra.mxu0 %v1243_v45  ;;  %v1335_v18 = vsel %vm592_vm3, %v1324_v15, 0 }
 0x5ef   : > { %3011 = vmatprep.subr.msk.bf16.mxu0 %vm592_vm3, %v1322_v40  ;;  %v3666_v41 = vpop.eup %3120 }
 0x5f0   : > { %v3668_v42 = vpop.eup %3122  ;;  %v1230_v52 = vpack.c.bf16 %v3666_v41, %v3666_v41 }
 0x5f1   : > { %v1423_v26 = vpop.permute.xlu1 %1422 }
 0x5f2   : > { %v1432_v36 = vsel %vm700_vm4, %v1423_v26, 0 }
 0x5f3   : > { %v3670_v43 = vpop.eup %3124 }
 0x5f4   : > { %v1229_v51 = vpack.c.bf16 %v3670_v43, %v3668_v42 }
 0x5f6   : > { %2879 = vmatprep.mubr.msk.bf16.mxu0 %vm656_vm6, %v1229_v51 }
 0x5f7   : > { %2880 = vmatmul.mubr.msk.bf16.vlgmr.msra.gmra.mrb[8].mxu0 %vm656_vm6, %v1230_v52 }
 0x5f8   : > { %2884 = vmatpush3.bf16.xpose.msra.mxu0 %v1332_v56  ;;  %2887 = vmatprep.mubr.msk.bf16.mxu0 %vm592_vm3, %v3687_v58 }
 0x5f9   : > { %3012 = vmatprep.subr.msk.bf16.mxu0 %vm592_vm3, %v1324_v15 }
 0x600   : > { %2886 = vmatpush3.bf16.xpose.msra.mxu0 %v1335_v18 }
 0x607   : > { %2888 = vmatmul.mubr.msk.bf16.vlgmr.msra.gmra.mrb[12].mxu0 %vm592_vm3, %v3675_v44 }
 0x6ca   : > { %v3695_v57 = vpop.f32.mrb[8].mxu0 }
 0x6cb   : > { %v3697_v22 = vpop.f32.mrb[9].mxu0 }
 0x6cc   : > { %v2882_v59 = vpop.f32.mrb[10].mxu0 }
 0x6cd   : > { %v3699_v62 = vpop.f32.mrb[11].mxu0 }
 0x6da   : > { %v2889_v2 = vpop.f32.mrb[12].mxu0 }
 0x6db   : > { %v1387_v6 = vsel %vm585_vm5, %v2889_v2, -1e+30  ;;  %v1371_v8 = vpop.f32.mrb[13].mxu0 }
 0x6dc   : > { %v2890_v9 = vpop.f32.mrb[14].mxu0  ;;  %v1394_v10 = vsel %vm656_vm6, %v1387_v6, -inf  ;;  %v1385_v48 = vsel %vm585_vm5, %v1371_v8, -1e+30 }
 0x6dd   : > { %1395 = vmax.xlane.f32.xlu0 %v1394_v10  ;;  %v1374_v11 = vpop.f32.mrb[15].mxu0  ;;  %v1388_v19 = vsel %vm656_vm6, %v1385_v48, -inf }
 0x6de   : > { %v1386_v12 = vsel %vm585_vm5, %v1374_v11, -1e+30 }
 0x6df   : > { %v1391_v25 = vsel %vm656_vm6, %v1386_v12, -inf }
 0x6e0   : > { %1392 = vmax.xlane.f32.xlu1 %v1391_v25 }
 0x6e1   : > { %1389 = vmax.xlane.f32.xlu0 %v1388_v19 }
 0x6f1   : > { %1492 = vrot.lane.b32.xlu1 %v3653_v32, %s3271_s0 }
 0x6f5   : > { %1488 = vrot.lane.b32.xlu1 %v3687_v58, %s3273_s29 }
 0x6f7   : > { %1420 = vrot.lane.b32.xlu0 %v3653_v32, %s3276_s16 }
 0x6fb   : > { %1494 = vrot.lane.b32.xlu0 %v3646_v46, %s3271_s0 }
 0x6ff   : > { %1490 = vrot.lane.b32.xlu0 %v3675_v44, %s3273_s29 }
 0x76a   : > { %v1396_v29 = vpop.xlane.xlu0 %1395 }
 0x76b   : > { %v1399_v31 = vsub.f32 %v1387_v6, %v1396_v29 }
 0x76d   : > { %v1404_v14 = vmul.f32 1.442695, %v1399_v31  ;;  %v1393_v17 = vpop.xlane.xlu1 %1392 }
 0x76e   : > { %v1398_v20 = vsub.f32 %v1386_v12, %v1393_v17  ;;  %v1390_v55 = vpop.xlane.xlu0 %1389 }
 0x76f   : > { %v1397_v33 = vsub.f32 %v1385_v48, %v1390_v55  ;;  %3126 = vpow2.f32 %v1404_v14 }
 0x770   : > { %v1402_v13 = vmul.f32 1.442695, %v1398_v20 }
 0x771   : > { %v1400_v34 = vmul.f32 1.442695, %v1397_v33  ;;  %v1493_v37 = vpop.permute.xlu1 %1492 }
 0x772   : > { %3128 = vpow2.f32 %v1402_v13  ;;  %v1421_v35 = vpop.permute.xlu0 %1420  ;;  %v1503_v54 = vsel %vm592_vm3, %v1493_v37, 0 }
 0x773   : > { %3130 = vpow2.f32 %v1400_v34  ;;  %2891 = vmatprep.subr.bf16.mxu1 %v1421_v35 }
 0x774   : > { %2892 = vmatpush3.bf16.msra.mxu1 %v1421_v35 }
 0x775   : > { %3013 = vmatprep.subr.msk.bf16.mxu1 %vm700_vm4, %v1423_v26  ;;  %v1489_v56 = vpop.permute.xlu1 %1488 }
 0x776   : > { %v1495_v15 = vpop.permute.xlu0 %1494 }
 0x777   : > { %v1506_v18 = vsel %vm592_vm3, %v1495_v15, 0 }
 0x778   : > { %2894 = vmatpush3.bf16.msra.mxu1 %v1432_v36 }
 0x779   : > { %3014 = vmatprep.subr.msk.bf16.mxu1 %vm592_vm3, %v1493_v37  ;;  %v3723_v39 = vpop.eup %3126 }
 0x77a   : > { %v1419_v52 = vpack.c.bf16 %v3723_v39, %v3723_v39  ;;  %v1491_v59 = vpop.permute.xlu0 %1490 }
 0x77c   : > { %v3725_v45 = vpop.eup %3128 }
 0x77d   : > { %v3727_v40 = vpop.eup %3130 }
 0x77e   : > { %v1418_v51 = vpack.c.bf16 %v3725_v45, %v3727_v40 }
 0x780   : > { %2895 = vmatprep.mubr.msk.bf16.mxu1 %vm656_vm6, %v1418_v51 }
 0x781   : > { %2896 = vmatmul.mubr.msk.bf16.vlgmr.msra.gmra.mrb[32].mxu1 %vm656_vm6, %v1419_v52 }
 0x782   : > { %2900 = vmatpush3.bf16.xpose.msra.mxu1 %v1503_v54  ;;  %2903 = vmatprep.mubr.msk.bf16.mxu1 %vm592_vm3, %v1489_v56 }
 0x783   : > { %3015 = vmatprep.subr.msk.bf16.mxu1 %vm592_vm3, %v1495_v15 }
 0x78a   : > { %2902 = vmatpush3.bf16.xpose.msra.mxu1 %v1506_v18 }
 0x791   : > { %2904 = vmatmul.mubr.msk.bf16.vlgmr.msra.gmra.mrb[36].mxu1 %vm592_vm3, %v1491_v59 }
 0x854   : > { %v3740_v2 = vpop.f32.mrb[32].mxu1 }
 0x855   : > { %v3742_v6 = vpop.f32.mrb[33].mxu1 }
 0x856   : > { %v2898_v8 = vpop.f32.mrb[34].mxu1 }
 0x857   : > { %v3744_v9 = vpop.f32.mrb[35].mxu1 }
 0x864   : > { %v2905_v10 = vpop.f32.mrb[36].mxu1 }
 0x865   : > { %v1558_v48 = vsel %vm585_vm5, %v2905_v10, -1e+30  ;;  %v1542_v11 = vpop.f32.mrb[37].mxu1 }
 0x866   : > { %v1556_v12 = vsel %vm585_vm5, %v1542_v11, -1e+30  ;;  %v2906_v25 = vpop.f32.mrb[38].mxu1  ;;  %v1565_v19 = vsel %vm656_vm6, %v1558_v48, -inf }
 0x867   : > { %1566 = vmax.xlane.f32.xlu0 %v1565_v19  ;;  %v1545_v26 = vpop.f32.mrb[39].mxu1  ;;  %v1559_v29 = vsel %vm656_vm6, %v1556_v12, -inf }
 0x868   : > { %v1557_v31 = vsel %vm585_vm5, %v1545_v26, -1e+30  ;;  %1560 = vmax.xlane.f32.xlu1 %v1559_v29 }
 0x869   : > { %v1562_v14 = vsel %vm656_vm6, %v1557_v31, -inf }
 0x86b   : > { %1563 = vmax.xlane.f32.xlu0 %v1562_v14 }
 0x879   : > { %1593 = vrot.lane.b32.xlu1 %v3646_v46, %s3277_s17 }
 0x87d   : > { %1675 = vrot.lane.b32.xlu1 %v3653_v32, %s3275_s10 }
 0x881   : > { %1677 = vrot.lane.b32.xlu1 %v3646_v46, %s3275_s10  ;;  %1591 = vrot.lane.b32.xlu0 %v3653_v32, %s3277_s17 }
 0x885   : > { %1673 = vrot.lane.b32.xlu1 %v3675_v44, %s3274_s7  ;;  %1671 = vrot.lane.b32.xlu0 %v3687_v58, %s3274_s7 }
 0x889   : > { %1776 = vrot.lane.b32.xlu1 %v3646_v46, %s3278_s18 }
 0x8f4   : > { %v1567_v17 = vpop.xlane.xlu0 %1566 }
 0x8f5   : > { %v1570_v20 = vsub.f32 %v1558_v48, %v1567_v17  ;;  %v1561_v55 = vpop.xlane.xlu1 %1560 }
 0x8f6   : > { %v1568_v33 = vsub.f32 %v1556_v12, %v1561_v55 }
 0x8f7   : > { %v1575_v13 = vmul.f32 1.442695, %v1570_v20 }
 0x8f8   : > { %v1571_v34 = vmul.f32 1.442695, %v1568_v33  ;;  %v1564_v35 = vpop.xlane.xlu0 %1563 }
 0x8f9   : > { %v1569_v36 = vsub.f32 %v1557_v31, %v1564_v35  ;;  %3132 = vpow2.f32 %v1575_v13  ;;  %v1594_v51 = vpop.permute.xlu1 %1593 }
 0x8fa   : > { %3134 = vpow2.f32 %v1571_v34  ;;  %v1603_v54 = vsel %vm700_vm4, %v1594_v51, 0 }
 0x8fb   : > { %v1573_v37 = vmul.f32 1.442695, %v1569_v36 }
 0x8fc   : > { %v1592_v52 = vpop.permute.xlu0 %1591 }
 0x8fd   : > { %3136 = vpow2.f32 %v1573_v37  ;;  %2907 = vmatprep.subr.bf16.mxu0 %v1592_v52  ;;  %v1676_v56 = vpop.permute.xlu1 %1675 }
 0x8fe   : > { %2908 = vmatpush3.bf16.msra.mxu0 %v1592_v52  ;;  %v1686_v48 = vsel %vm592_vm3, %v1676_v56, 0 }
 0x8ff   : > { %3016 = vmatprep.subr.msk.bf16.mxu0 %vm700_vm4, %v1594_v51 }
 0x900   : > { %v1672_v11 = vpop.permute.xlu0 %1671 }
 0x901   : > { %v1678_v12 = vpop.permute.xlu1 %1677 }
 0x902   : > { %2910 = vmatpush3.bf16.msra.mxu0 %v1603_v54  ;;  %v1689_v25 = vsel %vm592_vm3, %v1678_v12, 0 }
 0x903   : > { %3017 = vmatprep.subr.msk.bf16.mxu0 %vm592_vm3, %v1676_v56  ;;  %v3772_v15 = vpop.eup %3132 }
 0x904   : > { %v3774_v18 = vpop.eup %3134  ;;  %v1590_v10 = vpack.c.bf16 %v3772_v15, %v3772_v15 }
 0x905   : > { %v1674_v19 = vpop.permute.xlu1 %1673 }
 0x907   : > { %v3776_v59 = vpop.eup %3136 }
 0x908   : > { %v1589_v8 = vpack.c.bf16 %v3776_v59, %v3774_v18 }
 0x909   : > { %v1777_v52 = vpop.permute.xlu1 %1776 }
 0x90a   : > { %2911 = vmatprep.mubr.msk.bf16.mxu0 %vm656_vm6, %v1589_v8 }
 0x90b   : > { %2912 = vmatmul.mubr.msk.bf16.vlgmr.msra.gmra.mrb[16].mxu0 %vm656_vm6, %v1590_v10 }
 0x90c   : > { %2916 = vmatpush3.bf16.xpose.msra.mxu0 %v1686_v48  ;;  %2919 = vmatprep.mubr.msk.bf16.mxu0 %vm592_vm3, %v1672_v11 }
 0x90d   : > { %3018 = vmatprep.subr.msk.bf16.mxu0 %vm592_vm3, %v1678_v12 }
 0x914   : > { %2918 = vmatpush3.bf16.xpose.msra.mxu0 %v1689_v25 }
 0x91b   : > { %2920 = vmatmul.mubr.msk.bf16.vlgmr.msra.gmra.mrb[20].mxu0 %vm592_vm3, %v1674_v19 }
 0x9de   : > { %v3789_v26 = vpop.f32.mrb[16].mxu0 }
 0x9df   : > { %v3791_v29 = vpop.f32.mrb[17].mxu0 }
 0x9e0   : > { %v2914_v31 = vpop.f32.mrb[18].mxu0 }
 0x9e1   : > { %v3793_v14 = vpop.f32.mrb[19].mxu0 }
 0x9ee   : > { %v2921_v17 = vpop.f32.mrb[20].mxu0 }
 0x9ef   : > { %v1741_v20 = vsel %vm585_vm5, %v2921_v17, -1e+30  ;;  %v1725_v55 = vpop.f32.mrb[21].mxu0 }
 0x9f0   : > { %v2922_v33 = vpop.f32.mrb[22].mxu0  ;;  %v1748_v13 = vsel %vm656_vm6, %v1741_v20, -inf  ;;  %v1739_v34 = vsel %vm585_vm5, %v1725_v55, -1e+30 }
 0x9f1   : > { %1749 = vmax.xlane.f32.xlu0 %v1748_v13  ;;  %v1728_v35 = vpop.f32.mrb[23].mxu0  ;;  %v1742_v51 = vsel %vm656_vm6, %v1739_v34, -inf }
 0x9f2   : > { %v1740_v36 = vsel %vm585_vm5, %v1728_v35, -1e+30 }
 0x9f3   : > { %v1745_v37 = vsel %vm656_vm6, %v1740_v36, -inf }
 0x9f4   : > { %1746 = vmax.xlane.f32.xlu1 %v1745_v37 }
 0x9f5   : > { %1743 = vmax.xlane.f32.xlu0 %v1742_v51 }
 0xa05   : > { %1858 = vrot.lane.b32.xlu1 %v3653_v32, %s3279_s20 }
 0xa09   : > { %1854 = vrot.lane.b32.xlu1 %v3687_v58, %s3280_s22 }
 0xa0b   : > { %1774 = vrot.lane.b32.xlu0 %v3653_v32, %s3278_s18 }
 0xa0f   : > { %1860 = vrot.lane.b32.xlu0 %v3646_v46, %s3279_s20 }
 0xa13   : > { %1856 = vrot.lane.b32.xlu0 %v3675_v44, %s3280_s22  ;;  %v1786_v44 = vsel %vm700_vm4, %v1777_v52, 0 }
 0xa7e   : > { %v1750_v54 = vpop.xlane.xlu0 %1749 }
 0xa7f   : > { %v1753_v56 = vsub.f32 %v1741_v20, %v1750_v54 }
 0xa81   : > { %v1758_v8 = vmul.f32 1.442695, %v1753_v56  ;;  %v1747_v10 = vpop.xlane.xlu1 %1746 }
 0xa82   : > { %v1752_v48 = vsub.f32 %v1740_v36, %v1747_v10  ;;  %v1744_v11 = vpop.xlane.xlu0 %1743 }
 0xa83   : > { %v1751_v12 = vsub.f32 %v1739_v34, %v1744_v11  ;;  %3138 = vpow2.f32 %v1758_v8 }
 0xa84   : > { %v1756_v25 = vmul.f32 1.442695, %v1752_v48 }
 0xa85   : > { %v1754_v58 = vmul.f32 1.442695, %v1751_v12  ;;  %v1859_v31 = vpop.permute.xlu1 %1858 }
 0xa86   : > { %3140 = vpow2.f32 %v1756_v25  ;;  %v1775_v19 = vpop.permute.xlu0 %1774  ;;  %v1869_v34 = vsel %vm592_vm3, %v1859_v31, 0 }
 0xa87   : > { %3142 = vpow2.f32 %v1754_v58  ;;  %2923 = vmatprep.subr.bf16.mxu1 %v1775_v19 }
 0xa88   : > { %2924 = vmatpush3.bf16.msra.mxu1 %v1775_v19 }
 0xa89   : > { %3019 = vmatprep.subr.msk.bf16.mxu1 %vm700_vm4, %v1777_v52  ;;  %v1855_v35 = vpop.permute.xlu1 %1854 }
 0xa8a   : > { %v1861_v36 = vpop.permute.xlu0 %1860 }
 0xa8b   : > { %v1872_v37 = vsel %vm592_vm3, %v1861_v36, 0 }
 0xa8c   : > { %2926 = vmatpush3.bf16.msra.mxu1 %v1786_v44 }
 0xa8d   : > { %3020 = vmatprep.subr.msk.bf16.mxu1 %vm592_vm3, %v1859_v31  ;;  %v3817_v17 = vpop.eup %3138 }
 0xa8e   : > { %v1773_v13 = vpack.c.bf16 %v3817_v17, %v3817_v17  ;;  %v1857_v51 = vpop.permute.xlu0 %1856 }
 0xa90   : > { %v3819_v20 = vpop.eup %3140 }
 0xa91   : > { %v3143_v55 = vpop.eup %3142  ;;  %v1763_v30 = vsel %vm656_vm6, %v3819_v20, 0.0 }
 0xa92   : > { %v1772_v33 = vpack.c.bf16 %v3819_v20, %v3143_v55 }
 0xa94   : > { %2927 = vmatprep.mubr.msk.bf16.mxu1 %vm656_vm6, %v1772_v33 }
 0xa95   : > { %2928 = vmatmul.mubr.msk.bf16.vlgmr.msra.gmra.mrb[40].mxu1 %vm656_vm6, %v1773_v13  ;;  %v849_v13 = vsel %vm656_vm6, %v3576_v27, 0.0  ;;  %v1217_v27 = vsel %vm656_vm6, %v3668_v42, 0.0  ;;  %v1223_v42 = vsel %vm656_vm6, %v3666_v41, 0.0 }
 0xa96   : > { %2932 = vmatpush3.bf16.xpose.msra.mxu1 %v1869_v34  ;;  %2935 = vmatprep.mubr.msk.bf16.mxu1 %vm592_vm3, %v1855_v35  ;;  %v852_v34 = vsel %vm656_vm6, %v3579_v28, 0.0  ;;  %v1033_v35 = vsel %vm656_vm6, %v3601_v49, 0.0  ;;  %v1577_v28 = vsel %vm656_vm6, %v3774_v18, 0.0  ;;  %v1039_v49 = vsel %vm656_vm6, %v3599_v47, 0.0 }
 0xa97   : > { %3021 = vmatprep.subr.msk.bf16.mxu1 %vm592_vm3, %v1861_v36  ;;  %v1580_v18 = vsel %vm656_vm6, %v3776_v59, 0.0 }
 0xa9e   : > { %2934 = vmatpush3.bf16.xpose.msra.mxu1 %v1872_v37 }
 0xa9f   : > { %2963 = vmatprep.subr.bf16.mxu1 %v3269_v38 }
 0xaa5   : > { %2936 = vmatmul.mubr.msk.bf16.vlgmr.msra.gmra.mrb[44].mxu1 %vm592_vm3, %v1857_v51 }
 0xaa6   : > { %2967 = vmatprep.mubr.msk.bf16.mxu1 %vm3270_vm2, %v3269_v38 }
 0xb68   : > { %v3834_v52 = vpop.f32.mrb[40].mxu1 }
 0xb69   : > { %v3836_v54 = vpop.f32.mrb[41].mxu1 }
 0xb6a   : > { %v2930_v56 = vpop.f32.mrb[42].mxu1 }
 0xb6b   : > { %v3838_v8 = vpop.f32.mrb[43].mxu1 }
 0xb78   : > { %v2937_v10 = vpop.f32.mrb[44].mxu1 }
 0xb79   : > { %v1924_v48 = vsel %vm585_vm5, %v2937_v10, -1e+30  ;;  %v1908_v11 = vpop.f32.mrb[45].mxu1 }
 0xb7a   : > { %v1922_v12 = vsel %vm585_vm5, %v1908_v11, -1e+30  ;;  %v2938_v25 = vpop.f32.mrb[46].mxu1  ;;  %v1931_v58 = vsel %vm656_vm6, %v1924_v48, -inf }
 0xb7b   : > { %1932 = vmax.xlane.f32.xlu0 %v1931_v58  ;;  %v1911_v19 = vpop.f32.mrb[47].mxu1  ;;  %v1925_v44 = vsel %vm656_vm6, %v1922_v12, -inf }
 0xb7c   : > { %v1923_v31 = vsel %vm585_vm5, %v1911_v19, -1e+30  ;;  %1926 = vmax.xlane.f32.xlu1 %v1925_v44 }
 0xb7d   : > { %v1928_v33 = vsel %vm656_vm6, %v1923_v31, -inf }
 0xb7f   : > { %1929 = vmax.xlane.f32.xlu0 %v1928_v33 }
 0xb8d   : > { %1959 = vrot.lane.b32.xlu1 %v3646_v46, %s3281_s9  ;;  %v1220_v46 = vsel %vm656_vm6, %v3670_v43, 0.0  ;;  %v1583_v43 = vsel %vm656_vm6, %v3772_v15, 0.0 }
 0xb95   : > { %1957 = vrot.lane.b32.xlu0 %v3653_v32, %s3281_s9  ;;  %v1760_v32 = vsel %vm656_vm6, %v3143_v55, 0.0 }
 0xbb1   : > { %850 = vadd.xlane.f32.xlu1 %v849_v13  ;;  %v675_v13 = vsel %vm656_vm6, %v3568_v21, 0.0  ;;  %v1406_v21 = vsel %vm656_vm6, %v3727_v40, 0.0 }
 0xbb4   : > { %853 = vadd.xlane.f32.xlu0 %v852_v34 }
 0xbb5   : > { %1037 = vadd.xlane.f32.xlu1 %v1036_v23  ;;  %v681_v23 = vsel %vm656_vm6, %v3566_v16, 0.0 }
 0xbb8   : > { %1034 = vadd.xlane.f32.xlu0 %v1033_v35  ;;  %v1409_v35 = vsel %vm656_vm6, %v3725_v45, 0.0 }
 0xbb9   : > { %1221 = vadd.xlane.f32.xlu1 %v1220_v46  ;;  %v1412_v46 = vsel %vm656_vm6, %v3723_v39, 0.0 }
 0xbbc   : > { %1218 = vadd.xlane.f32.xlu0 %v1217_v27 }
 0xbbd   : > { %1578 = vadd.xlane.f32.xlu1 %v1577_v28 }
 0xbc0   : > { %856 = vadd.xlane.f32.xlu0 %v855_v50 }
 0xbc1   : > { %1761 = vadd.xlane.f32.xlu1 %v1760_v32 }
 0xbc4   : > { %1040 = vadd.xlane.f32.xlu0 %v1039_v49 }
 0xbc5   : > { %1584 = vadd.xlane.f32.xlu1 %v1583_v43 }
 0xbc8   : > { %1224 = vadd.xlane.f32.xlu0 %v1223_v42 }
 0xbcc   : > { %1581 = vadd.xlane.f32.xlu0 %v1580_v18  ;;  %v3082_v18 = vld [vmem:[%s3370_s19] sm:$0xff]  }
 0xbd0   : > { %1764 = vadd.xlane.f32.xlu0 %v1763_v30 }
 0xc08   : > { %v1933_v55 = vpop.xlane.xlu0 %1932 }
 0xc09   : > { %v1936_v36 = vsub.f32 %v1924_v48, %v1933_v55  ;;  %v1927_v47 = vpop.xlane.xlu1 %1926 }
 0xc0a   : > { %v1934_v37 = vsub.f32 %v1922_v12, %v1927_v47 }
 0xc0b   : > { %v1941_v51 = vmul.f32 1.442695, %v1936_v36 }
 0xc0c   : > { %v1937_v56 = vmul.f32 1.442695, %v1934_v37  ;;  %v1930_v15 = vpop.xlane.xlu0 %1929  ;;  %v3083_v37 = vld [vmem:[%s3370_s19 + $0x8] sm:$0xff]  }
 0xc0d   : > { %v1935_v10 = vsub.f32 %v1923_v31, %v1930_v15  ;;  %v1960_v59 = vpop.permute.xlu1 %1959  ;;  %v1766_v31 = vsel %vm656_vm6, %v3817_v17, 0.0  ;;  %v678_v17 = vsel %vm656_vm6, %v3570_v24, 0.0 }
 0xc0e   : > { %3144 = vpow2.f32 %v1937_v56  ;;  %v1969_v20 = vsel %vm700_vm4, %v1960_v59, 0 }
 0xc0f   : > { %v1939_v11 = vmul.f32 1.442695, %v1935_v10  ;;  %3146 = vpow2.f32 %v1941_v51 }
 0xc10   : > { %v1958_v41 = vpop.permute.xlu0 %1957 }
 0xc11   : > { %3148 = vpow2.f32 %v1939_v11  ;;  %2939 = vmatprep.subr.bf16.mxu0 %v1958_v41 }
 0xc12   : > { %2940 = vmatpush3.bf16.msra.mxu0 %v1958_v41 }
 0xc13   : > { %3022 = vmatprep.subr.msk.bf16.mxu0 %vm700_vm4, %v1960_v59 }
 0xc16   : > { %2942 = vmatpush3.bf16.msra.mxu0 %v1969_v20 }
 0xc17   : > { %2947 = vmatprep.subr.bf16.mxu0 %v3269_v38 }
 0xc18   : > { %v3145_v48 = vpop.eup %3144 }
 0xc19   : > { %v1943_v12 = vsel %vm656_vm6, %v3145_v48, 0.0  ;;  %v3147_v25 = vpop.eup %3146 }
 0xc1a   : > { %1944 = vadd.xlane.f32.xlu1 %v1943_v12  ;;  %v1956_v33 = vpack.c.bf16 %v3147_v25, %v3147_v25  ;;  %v1949_v34 = vsel %vm656_vm6, %v3147_v25, 0.0 }
 0xc1b   : > { %v3149_v58 = vpop.eup %3148 }
 0xc1c   : > { %v1946_v19 = vsel %vm656_vm6, %v3149_v58, 0.0  ;;  %v1955_v44 = vpack.c.bf16 %v3149_v58, %v3145_v48 }
 0xc1d   : > { %1947 = vadd.xlane.f32.xlu0 %v1946_v19 }
 0xc1e   : > { %1767 = vadd.xlane.f32.xlu1 %v1766_v31  ;;  %2943 = vmatprep.mubr.msk.bf16.mxu0 %vm656_vm6, %v1955_v44 }
 0xc1f   : > { %2944 = vmatmul.mubr.msk.bf16.vlgmr.msra.gmra.mrb[24].mxu0 %vm656_vm6, %v1956_v33 }
 0xc20   : > { %2951 = vmatprep.mubr.msk.bf16.mxu0 %vm3270_vm2, %v3269_v38  ;;  %2948 = vmatpush3.bf16.msra.mxu0 %v3082_v18 }
 0xc21   : > { %676 = vadd.xlane.f32.xlu0 %v675_v13  ;;  %2949 = vmatprep.subr.bf16.mxu0 %v3269_v38 }
 0xc22   : > { %1950 = vadd.xlane.f32.xlu1 %v1949_v34 }
 0xc24   : > { %2950 = vmatpush3.bf16.msra.mxu0 %v3083_v37 }
 0xc25   : > { %682 = vadd.xlane.f32.xlu0 %v681_v23  ;;  %2979 = vmatprep.subr.bf16.mxu0 %v3269_v38 }
 0xc26   : > { %679 = vadd.xlane.f32.xlu1 %v678_v17 }
 0xc29   : > { %1410 = vadd.xlane.f32.xlu0 %v1409_v35 }
 0xc2a   : > { %1407 = vadd.xlane.f32.xlu1 %v1406_v21 }
 0xc2e   : > { %1413 = vadd.xlane.f32.xlu1 %v1412_v46 }
 0xc3e   : > { %v851_v27 = vpop.xlane.xlu1 %850 }
 0xc3f   : > { %3150 = vrcp.f32 %v851_v27 }
 0xc41   : > { %v854_v16 = vpop.xlane.xlu0 %853 }
 0xc42   : > { %3152 = vrcp.f32 %v854_v16  ;;  %v1038_v28 = vpop.xlane.xlu1 %1037 }
 0xc45   : > { %v1035_v50 = vpop.xlane.xlu0 %1034 }
 0xc46   : > { %3154 = vrcp.f32 %v1035_v50  ;;  %v1222_v24 = vpop.xlane.xlu1 %1221 }
 0xc47   : > { %3156 = vrcp.f32 %v1038_v28 }
 0xc49   : > { %v3151_v45 = vpop.eup %3150  ;;  %v1219_v32 = vpop.xlane.xlu0 %1218 }
 0xc4a   : > { %3158 = vrcp.f32 %v1219_v32  ;;  %v1579_v49 = vpop.xlane.xlu1 %1578  ;;  %v925_v40 = vmul.f32 %v3151_v45, %v3624_v1 }
 0xc4b   : > { %3160 = vrcp.f32 %v1222_v24 }
 0xc4c   : > { %v3153_v43 = vpop.eup %3152  ;;  %931 = vrot.lane.b32.xlu0 %v925_v40, %s3282_s11 }
 0xc4d   : > { %v857_v39 = vpop.xlane.xlu0 %856  ;;  %v926_v42 = vmul.f32 %v3153_v43, %v3626_v3 }
 0xc4e   : > { %3162 = vrcp.f32 %v857_v39  ;;  %v1762_v30 = vpop.xlane.xlu1 %1761 }
 0xc4f   : > { %933 = vrot.lane.b32.xlu1 %v926_v42, %s3282_s11  ;;  %3164 = vrcp.f32 %v1579_v49 }
 0xc50   : > { %v3155_v55 = vpop.eup %3154 }
 0xc51   : > { %v1041_v36 = vpop.xlane.xlu0 %1040  ;;  %v1109_v1 = vmul.f32 %v3155_v55, %v3630_v5  ;;  %v3157_v47 = vpop.eup %3156 }
 0xc52   : > { %3166 = vrcp.f32 %v1041_v36  ;;  %v1585_v51 = vpop.xlane.xlu1 %1584  ;;  %v1110_v15 = vmul.f32 %v3157_v47, %v3632_v7 }
 0xc53   : > { %1115 = vrot.lane.b32.xlu1 %v1109_v1, %s3283_s12  ;;  %3168 = vrcp.f32 %v1762_v30 }
 0xc54   : > { %v3159_v3 = vpop.eup %3158 }
 0xc55   : > { %v1225_v56 = vpop.xlane.xlu0 %1224  ;;  %v1293_v10 = vmul.f32 %v3159_v3, %v3697_v22  ;;  %v3161_v5 = vpop.eup %3160 }
 0xc56   : > { %3170 = vrcp.f32 %v1225_v56  ;;  %v1294_v59 = vmul.f32 %v3161_v5, %v3699_v62 }
 0xc57   : > { %1117 = vrot.lane.b32.xlu1 %v1110_v15, %s3283_s12  ;;  %1299 = vrot.lane.b32.xlu0 %v1293_v10, %s3284_s14  ;;  %3172 = vrcp.f32 %v1585_v51 }
 0xc58   : > { %v3163_v11 = vpop.eup %3162 }
 0xc59   : > { %v1582_v41 = vpop.xlane.xlu0 %1581  ;;  %v927_v20 = vmul.f32 %v3163_v11, %v3622_v0  ;;  %v3165_v48 = vpop.eup %3164 }
 0xc5a   : > { %3174 = vrcp.f32 %v1582_v41  ;;  %v1653_v12 = vmul.f32 %v3165_v48, %v3791_v29 }
 0xc5b   : > { %1301 = vrot.lane.b32.xlu1 %v1294_v59, %s3284_s14  ;;  %935 = vrot.lane.b32.xlu0 %v927_v20, %s3282_s11 }
 0xc5c   : > { %v3167_v7 = vpop.eup %3166 }
 0xc5d   : > { %v1765_v22 = vpop.xlane.xlu0 %1764  ;;  %v1111_v25 = vmul.f32 %v3167_v7, %v3628_v4  ;;  %v3169_v58 = vpop.eup %3168 }
 0xc5e   : > { %3176 = vrcp.f32 %v1765_v22  ;;  %v1836_v0 = vmul.f32 %v3169_v58, %v3836_v54 }
 0xc5f   : > { %1659 = vrot.lane.b32.xlu1 %v1653_v12, %s3282_s11  ;;  %1119 = vrot.lane.b32.xlu0 %v1111_v25, %s3283_s12 }
 0xc60   : > { %v3171_v62 = vpop.eup %3170 }
 0xc61   : > { %v1295_v19 = vmul.f32 %v3171_v62, %v3695_v57  ;;  %v3173_v44 = vpop.eup %3172 }
 0xc62   : > { %v1655_v29 = vmul.f32 %v3173_v44, %v3789_v26 }
 0xc63   : > { %1842 = vrot.lane.b32.xlu1 %v1836_v0, %s3283_s12  ;;  %1303 = vrot.lane.b32.xlu0 %v1295_v19, %s3284_s14 }
 0xc64   : > { %v3175_v31 = vpop.eup %3174 }
 0xc65   : > { %v1654_v4 = vmul.f32 %v3175_v31, %v3793_v14 }
 0xc67   : > { %1663 = vrot.lane.b32.xlu1 %v1655_v29, %s3282_s11  ;;  %1661 = vrot.lane.b32.xlu0 %v1654_v4, %s3282_s11 }
 0xc68   : > { %v3177_v33 = vpop.eup %3176 }
 0xc69   : > { %v1837_v13 = vmul.f32 %v3177_v33, %v3838_v8 }
 0xc6b   : > { %1844 = vrot.lane.b32.xlu0 %v1837_v13, %s3283_s12  ;;  %v2136_v13 = vsub.s32 2, %v3421_v53 }
 0xca7   : > { %v3936_v57 = vpop.xlane.xlu1 %1944 }
 0xcaa   : > { %v3938_v54 = vpop.xlane.xlu0 %1947 }
 0xcab   : > { %v1768_v34 = vpop.xlane.xlu1 %1767 }
 0xcac   : > { %3178 = vrcp.f32 %v1768_v34 }
 0xcae   : > { %v677_v23 = vpop.xlane.xlu0 %676 }
 0xcaf   : > { %3180 = vrcp.f32 %v677_v23  ;;  %v3940_v26 = vpop.xlane.xlu1 %1950  ;;  %v3223_v23 = vld [vmem:[#allocation2] sm:$0xff] }
 0xcb2   : > { %v683_v14 = vpop.xlane.xlu0 %682 }
 0xcb3   : > { %3182 = vrcp.f32 %v683_v14  ;;  %v680_v17 = vpop.xlane.xlu1 %679 }
 0xcb4   : > { %3184 = vrcp.f32 %v680_v17 }
 0xcb6   : > { %v3179_v35 = vpop.eup %3178  ;;  %v1411_v21 = vpop.xlane.xlu0 %1410 }
 0xcb7   : > { %3186 = vrcp.f32 %v1411_v21  ;;  %v1408_v8 = vpop.xlane.xlu1 %1407  ;;  %v3943_v46 = vmul.f32 %v3179_v35, %v3834_v52  ;;  %v3224_v21 = vld [vmem:[#allocation2 + $0x8] sm:$0xff] }
 0xcb8   : > { %3188 = vrcp.f32 %v1408_v8 }
 0xcb9   : > { %v3181_v27 = vpop.eup %3180 }
 0xcba   : > { %v752_v16 = vmul.f32 %v3181_v27, %v3618_v61 }
 0xcbb   : > { %v1414_v28 = vpop.xlane.xlu1 %1413 }
 0xcbc   : > { %3190 = vrcp.f32 %v1414_v28  ;;  %755 = vst.msk [vmem:[#allocation3] sm:$0xff] %vm592_vm3, %v752_v16 }
 0xcbd   : > { %v3183_v50 = vpop.eup %3182  ;;  %3192 = vrcp.f32 %v3940_v26 }
 0xcbe   : > { %v3185_v24 = vpop.eup %3184  ;;  %v932_v45 = vpop.permute.xlu0 %931  ;;  %v754_v32 = vmul.f32 %v3183_v50, %v3616_v60  ;;  %3194 = vrcp.f32 %v3936_v57  ;;  %v3994_v57 = vld [vmem:[%s3360_s13] sm:$0xff] }
 0xcbf   : > { %941 = vst.msk [vmem:[#allocation3] sm:$0xff] %vm940_vm7, %v932_v45  ;;  %v753_v49 = vmul.f32 %v3185_v24, %v3620_v63  ;;  %3196 = vrcp.f32 %v3938_v54  ;;  %v2137_v54 = vrot.slane %v3994_v57, %v2136_v13  ;;  %v3225_v24 = vld [vmem:[#allocation2 + $0x10] sm:$0xff] }
 0xcc0   : > { %757 = vst.msk [vmem:[#allocation3 + $0x10] sm:$0xff] %vm592_vm3, %v754_v32 }
 0xcc1   : > { %v3187_v52 = vpop.eup %3186  ;;  %756 = vst.msk [vmem:[#allocation3 + $0x8] sm:$0xff] %vm592_vm3, %v753_v49  ;;  %v934_v61 = vpop.permute.xlu1 %933 }
 0xcc2   : > { %v3189_v40 = vpop.eup %3188  ;;  %942 = vst.msk [vmem:[#allocation3 + $0x8] sm:$0xff] %vm940_vm7, %v934_v61  ;;  %v1483_v43 = vmul.f32 %v3187_v52, %v3744_v9 }
 0xcc3   : > { %v1482_v39 = vmul.f32 %v3189_v40, %v3742_v6  ;;  %v3226_v40 = vld [vmem:[#allocation2 + $0x18] sm:$0xff] }
 0xcc4   : > { %1486 = vst.msk [vmem:[#allocation3 + $0x20] sm:$0xff] %vm592_vm3, %v1483_v43 }
 0xcc5   : > { %v1116_v60 = vpop.permute.xlu1 %1115  ;;  %1485 = vst.msk [vmem:[#allocation3 + $0x18] sm:$0xff] %vm592_vm3, %v1482_v39 }
 0xcc6   : > { %v3191_v63 = vpop.eup %3190  ;;  %1125 = vst.msk [vmem:[#allocation3] sm:$0xff] %vm1124_vm8, %v1116_v60 }
 0xcc7   : > { %v1484_v42 = vmul.f32 %v3191_v63, %v3740_v2  ;;  %v3193_v10 = vpop.eup %3192 }
 0xcc8   : > { %v3195_v11 = vpop.eup %3194 }
 0xcc9   : > { %v1118_v18 = vpop.permute.xlu1 %1117  ;;  %v1300_v30 = vpop.permute.xlu0 %1299  ;;  %1487 = vst.msk [vmem:[#allocation3 + $0x28] sm:$0xff] %vm592_vm3, %v1484_v42 }
 0xcca   : > { %1126 = vst.msk [vmem:[#allocation3 + $0x8] sm:$0xff] %vm1124_vm8, %v1118_v18  ;;  %v3197_v7 = vpop.eup %3196 }
 0xccb   : > { %1309 = vst.msk [vmem:[#allocation3] sm:$0xff] %vm1308_vm9, %v1300_v30 }
 0xccd   : > { %v1302_v6 = vpop.permute.xlu1 %1301  ;;  %v936_v9 = vpop.permute.xlu0 %935 }
 0xcce   : > { %1310 = vst.msk [vmem:[#allocation3 + $0x8] sm:$0xff] %vm1308_vm9, %v1302_v6 }
 0xccf   : > { %943 = vst.msk [vmem:[#allocation3 + $0x10] sm:$0xff] %vm940_vm7, %v936_v9 }
 0xcd1   : > { %v1660_v55 = vpop.permute.xlu1 %1659  ;;  %v1120_v36 = vpop.permute.xlu0 %1119 }
 0xcd2   : > { %1668 = vst.msk [vmem:[#allocation3 + $0x18] sm:$0xff] %vm940_vm7, %v1660_v55  ;;  %v2037_v47 = vld [vmem:[#allocation3] sm:$0xff]  ;;  %v3227_v55 = vld [vmem:[#allocation2 + $0x20] sm:$0xff] }
 0xcd3   : > { %1127 = vst.msk [vmem:[#allocation3 + $0x10] sm:$0xff] %vm1124_vm8, %v1120_v36 }
 0xcd5   : > { %v1843_v2 = vpop.permute.xlu1 %1842  ;;  %v1304_v1 = vpop.permute.xlu0 %1303  ;;  %v2038_v37 = vld [vmem:[#allocation3 + $0x8] sm:$0xff] }
 0xcd6   : > { %1851 = vst.msk [vmem:[#allocation3 + $0x18] sm:$0xff] %vm1124_vm8, %v1843_v2  ;;  %v2043_v3 = vpack.c.bf16 %v2038_v37, %v2037_v47 }
 0xcd7   : > { %1311 = vst.msk [vmem:[#allocation3 + $0x10] sm:$0xff] %vm1308_vm9, %v1304_v1 }
 0xcd8   : > { %2952 = vmatmul.mubr.msk.bf16.vlgmr.msra.gmra.mrb[28].mxu0 %vm386_vm1, %v2043_v3 }
 0xcd9   : > { %v1664_v51 = vpop.permute.xlu1 %1663  ;;  %v1662_v56 = vpop.permute.xlu0 %1661  ;;  %2955 = vmatprep.mubr.msk.bf16.mxu0 %vm3270_vm2, %v3269_v38 }
 0xcda   : > { %1670 = vst.msk [vmem:[#allocation3 + $0x28] sm:$0xff] %vm940_vm7, %v1664_v51  ;;  %1669 = vst.msk [vmem:[#allocation3 + $0x20] sm:$0xff] %vm940_vm7, %v1662_v56  ;;  %v3228_v51 = vld [vmem:[#allocation2 + $0x28] sm:$0xff] }
 0xcdd   : > { %v1845_v15 = vpop.permute.xlu0 %1844 }
 0xcde   : > { %1852 = vst.msk [vmem:[#allocation3 + $0x20] sm:$0xff] %vm1124_vm8, %v1845_v15  ;;  %v2039_v19 = vld [vmem:[#allocation3 + $0x10] sm:$0xff] }
 0xcf2   : > { %v2945_v5 = vpop.f32.mrb[24].mxu0 }
 0xcf3   : > { %v2021_v41 = vmul.f32 %v3193_v10, %v2945_v5  ;;  %v2005_v59 = vpop.f32.mrb[25].mxu0 }
 0xcf4   : > { %v2019_v20 = vmul.f32 %v3195_v11, %v2005_v59  ;;  %v2946_v48 = vpop.f32.mrb[26].mxu0 }
 0xcf5   : > { %v2008_v22 = vpop.f32.mrb[27].mxu0 }
 0xcf6   : > { %v2020_v12 = vmul.f32 %v3197_v7, %v2008_v22  ;;  %2025 = vrot.lane.b32.xlu1 %v2019_v20, %s3284_s14  ;;  %v3084_v7 = vld [vmem:[%s3375_s8] sm:$0xff]   ;;  %v3085_v22 = vld [vmem:[%s3375_s8 + $0x8] sm:$0xff]  }
 0xcf7   : > { %2964 = vmatpush3.bf16.msra.mxu1 %v3084_v7 }
 0xcf8   : > { %2027 = vrot.lane.b32.xlu0 %v2020_v12, %s3284_s14  ;;  %2965 = vmatprep.subr.bf16.mxu1 %v3269_v38 }
 0xcfa   : > { %1846 = vrot.lane.b32.xlu1 %v3943_v46, %s3283_s12 }
 0xcfb   : > { %2966 = vmatpush3.bf16.msra.mxu1 %v3085_v22 }
 0xcfe   : > { %2029 = vrot.lane.b32.xlu1 %v2021_v41, %s3284_s14 }
 0xd68   : > { %v2026_v25 = vpop.permute.xlu1 %2025 }
 0xd69   : > { %2034 = vst.msk [vmem:[#allocation3 + $0x18] sm:$0xff] %vm1308_vm9, %v2026_v25 }
 0xd6a   : > { %v2028_v58 = vpop.permute.xlu0 %2027 }
 0xd6b   : > { %2035 = vst.msk [vmem:[#allocation3 + $0x20] sm:$0xff] %vm1308_vm9, %v2028_v58 }
 0xd6c   : > { %v1847_v62 = vpop.permute.xlu1 %1846 }
 0xd6d   : > { %1853 = vst.msk [vmem:[#allocation3 + $0x28] sm:$0xff] %vm1124_vm8, %v1847_v62 }
 0xd70   : > { %v2030_v0 = vpop.permute.xlu1 %2029  ;;  %v2040_v44 = vld [vmem:[#allocation3 + $0x18] sm:$0xff] }
 0xd71   : > { %2036 = vst.msk [vmem:[#allocation3 + $0x28] sm:$0xff] %vm1308_vm9, %v2030_v0  ;;  %v2044_v31 = vpack.c.bf16 %v2040_v44, %v2039_v19 }
 0xd72   : > { %v2041_v29 = vld [vmem:[#allocation3 + $0x20] sm:$0xff] }
 0xd73   : > { %2956 = vmatmul.mubr.msk.bf16.gmra.mrb[32].mxu0 %vm386_vm1, %v2044_v31 }
 0xd74   : > { %2959 = vmatprep.mubr.msk.bf16.mxu0 %vm3270_vm2, %v3269_v38 }
 0xd78   : > { %v2042_v4 = vld [vmem:[#allocation3 + $0x28] sm:$0xff] }
 0xd79   : > { %v2045_v33 = vpack.c.bf16 %v2042_v4, %v2041_v29 }
 0xd7b   : > { %2960 = vmatmul.mubr.msk.bf16.gmra.mrb[36].mxu0 %vm386_vm1, %v2045_v33 }
 0xd7c   : > { %2987 = vmatprep.mubr.msk.bf16.mxu0 %vm3270_vm2, %v3269_v38 }
 0xdab   : > { %v2105_v34 = vpop.f32.mrb[28].mxu0 }
 0xdac   : > { %v2128_v26 = vadd.f32 %v3223_v23, %v2105_v34  ;;  %v2953_v14 = vpop.f32.mrb[29].mxu0 }
 0xdad   : > { %v2108_v17 = vpop.f32.mrb[30].mxu0 }
 0xdae   : > { %v3997_v35 = vadd.f32 %v2137_v54, %v2128_v26  ;;  %v2129_v8 = vadd.f32 %v3224_v21, %v2108_v17  ;;  %v2954_v46 = vpop.f32.mrb[31].mxu0 }
 0xdb0   : > { %v3999_v27 = vadd.f32 %v2137_v54, %v2129_v8  ;;  %v2144_v16 = vsel %vm386_vm1, %v3997_v35, 0.0 }
 0xdb1   : > { %2145 = vadd.xlane.f32.xlu0 %v2144_v16 }
 0xdb2   : > { %v2147_v28 = vsel %vm386_vm1, %v3999_v27, 0.0 }
 0xdb3   : > { %2148 = vadd.xlane.f32.xlu1 %v2147_v28 }
 0xe3e   : > { %v2146_v49 = vpop.xlane.xlu0 %2145 }
 0xe3f   : > { %v2162_v63 = vmul.f32 0.03125, %v2146_v49 }
 0xe40   : > { %v2149_v60 = vpop.xlane.xlu1 %2148 }
 0xe41   : > { %v2163_v30 = vmul.f32 0.03125, %v2149_v60  ;;  %v4012_v9 = vsub.f32 %v3997_v35, %v2162_v63 }
 0xe43   : > { %v2169_v37 = vsub.f32 %v3999_v27, %v2163_v30  ;;  %v2174_v11 = vmul.f32 %v4012_v9, %v4012_v9 }
 0xe45   : > { %v2175_v59 = vmul.f32 %v2169_v37, %v2169_v37  ;;  %v2180_v20 = vsel %vm386_vm1, %v2174_v11, 0.0 }
 0xe46   : > { %v2113_v50 = vpop.f32.mrb[32].mxu0 }
 0xe47   : > { %v2130_v45 = vadd.f32 %v3225_v24, %v2113_v50  ;;  %v2957_v32 = vpop.f32.mrb[33].mxu0  ;;  %v2183_v48 = vsel %vm386_vm1, %v2175_v59, 0.0 }
 0xe48   : > { %v2116_v52 = vpop.f32.mrb[34].mxu0  ;;  %v2224_v32 = vsub.s32 3, %v3421_v53 }
 0xe49   : > { %v4005_v61 = vadd.f32 %v2137_v54, %v2130_v45  ;;  %v2131_v43 = vadd.f32 %v3226_v40, %v2116_v52  ;;  %v2958_v39 = vpop.f32.mrb[35].mxu0  ;;  %v2234_v52 = vsub.s32 4, %v3421_v53 }
 0xe4a   : > { %v2225_v49 = vrot.slane %v3994_v57, %v2224_v32 }
 0xe4b   : > { %v4007_v42 = vadd.f32 %v2137_v54, %v2131_v43  ;;  %v2150_v18 = vsel %vm386_vm1, %v4005_v61, 0.0 }
 0xe4c   : > { %2151 = vadd.xlane.f32.xlu0 %v2150_v18  ;;  %v2235_v18 = vrot.slane %v3994_v57, %v2234_v52 }
 0xe4d   : > { %v2153_v1 = vsel %vm386_vm1, %v4007_v42, 0.0 }
 0xe4e   : > { %v2121_v6 = vpop.f32.mrb[36].mxu0 }
 0xe4f   : > { %v2132_v36 = vadd.f32 %v3227_v55, %v2121_v6  ;;  %v2961_v2 = vpop.f32.mrb[37].mxu0 }
 0xe50   : > { %2154 = vadd.xlane.f32.xlu0 %v2153_v1  ;;  %v2124_v47 = vpop.f32.mrb[38].mxu0  ;;  %v3086_v2 = vld [vmem:[%s3380_s30] sm:$0xff]   ;;  %v3088_v1 = vld [vmem:[%s3380_s30 + $0x10] sm:$0xff]  }
 0xe51   : > { %v4017_v3 = vadd.f32 %v2137_v54, %v2132_v36  ;;  %v2133_v56 = vadd.f32 %v3228_v51, %v2124_v47  ;;  %v2962_v15 = vpop.f32.mrb[39].mxu0  ;;  %2980 = vmatpush3.bf16.msra.mxu0 %v3086_v2  ;;  %v3089_v47 = vld [vmem:[%s3380_s30 + $0x18] sm:$0xff]  }
 0xe52   : > { %2981 = vmatprep.subr.bf16.mxu0 %v3269_v38 }
 0xe53   : > { %v4019_v10 = vadd.f32 %v2137_v54, %v2133_v56  ;;  %v2156_v5 = vsel %vm386_vm1, %v4017_v3, 0.0 }
 0xe54   : > { %2157 = vadd.xlane.f32.xlu0 %v2156_v5 }
 0xe55   : > { %v2159_v41 = vsel %vm386_vm1, %v4019_v10, 0.0 }
 0xe56   : > { %2160 = vadd.xlane.f32.xlu1 %v2159_v41 }
 0xe58   : > { %2181 = vadd.xlane.f32.xlu0 %v2180_v20 }
 0xe5a   : > { %2184 = vadd.xlane.f32.xlu1 %v2183_v48 }
 0xed9   : > { %v2152_v12 = vpop.xlane.xlu0 %2151 }
 0xeda   : > { %v2164_v25 = vmul.f32 0.03125, %v2152_v12 }
 0xedc   : > { %v4033_v58 = vsub.f32 %v4005_v61, %v2164_v25 }
 0xedd   : > { %v2155_v62 = vpop.xlane.xlu0 %2154 }
 0xede   : > { %v2165_v0 = vmul.f32 0.03125, %v2155_v62  ;;  %v2176_v19 = vmul.f32 %v4033_v58, %v4033_v58 }
 0xee0   : > { %v4038_v44 = vsub.f32 %v4007_v42, %v2165_v0  ;;  %v2186_v31 = vsel %vm386_vm1, %v2176_v19, 0.0 }
 0xee1   : > { %2187 = vadd.xlane.f32.xlu0 %v2186_v31  ;;  %v2158_v29 = vpop.xlane.xlu0 %2157 }
 0xee2   : > { %v2166_v4 = vmul.f32 0.03125, %v2158_v29  ;;  %v2177_v33 = vmul.f32 %v4038_v44, %v4038_v44 }
 0xee3   : > { %v2161_v13 = vpop.xlane.xlu1 %2160 }
 0xee4   : > { %v4044_v54 = vsub.f32 %v4017_v3, %v2166_v4  ;;  %v2167_v34 = vmul.f32 0.03125, %v2161_v13  ;;  %v2189_v23 = vsel %vm386_vm1, %v2177_v33, 0.0 }
 0xee5   : > { %2190 = vadd.xlane.f32.xlu1 %v2189_v23  ;;  %v2182_v26 = vpop.xlane.xlu0 %2181 }
 0xee6   : > { %v4048_v14 = vsub.f32 %v4019_v10, %v2167_v34  ;;  %v2198_v17 = vmul.f32 0.03125, %v2182_v26  ;;  %v2178_v21 = vmul.f32 %v4044_v54, %v4044_v54 }
 0xee7   : > { %v2185_v8 = vpop.xlane.xlu1 %2184 }
 0xee8   : > { %v2204_v46 = vadd.f32 1e-05, %v2198_v17  ;;  %v2199_v16 = vmul.f32 0.03125, %v2185_v8  ;;  %v2192_v28 = vsel %vm386_vm1, %v2178_v21, 0.0  ;;  %v2179_v50 = vmul.f32 %v4048_v14, %v4048_v14 }
 0xee9   : > { %2193 = vadd.xlane.f32.xlu0 %v2192_v28 }
 0xeea   : > { %3198 = vrsqrt.f32 %v2204_v46  ;;  %v2205_v24 = vadd.f32 1e-05, %v2199_v16  ;;  %v2195_v45 = vsel %vm386_vm1, %v2179_v50, 0.0 }
 0xeeb   : > { %2196 = vadd.xlane.f32.xlu1 %v2195_v45 }
 0xeec   : > { %3200 = vrsqrt.f32 %v2205_v24 }
 0xef4   : > { %v3199_v40 = vpop.eup %3198 }
 0xef5   : > { %v2216_v43 = vmul.f32 %v3199_v40, %v4012_v9  ;;  %v3087_v9 = vld [vmem:[%s3380_s30 + $0x8] sm:$0xff]  }
 0xef6   : > { %v3201_v39 = vpop.eup %3200  ;;  %2982 = vmatpush3.bf16.msra.mxu0 %v3087_v9 }
 0xef7   : > { %v2226_v60 = vmul.f32 %v2225_v49, %v2216_v43  ;;  %v2217_v63 = vmul.f32 %v3201_v39, %v2169_v37  ;;  %2983 = vmatprep.subr.bf16.mxu0 %v3269_v38 }
 0xef9   : > { %v2227_v30 = vmul.f32 %v2225_v49, %v2217_v63  ;;  %v2236_v6 = vadd.f32 %v2235_v18, %v2226_v60 }
 0xefa   : > { %2984 = vmatpush3.bf16.msra.mxu0 %v3088_v1 }
 0xefb   : > { %v2237_v55 = vadd.f32 %v2235_v18, %v2227_v30  ;;  %2985 = vmatprep.subr.bf16.mxu0 %v3269_v38 }
 0xefd   : > { %v2242_v36 = vpack.c.bf16 %v2237_v55, %v2236_v6 }
 0xefe   : > { %2986 = vmatpush3.bf16.msra.mxu0 %v3089_v47 }
 0xeff   : > { %2968 = vmatmul.mubr.msk.bf16.vlgmr.msra.gmra.mrb[48].mxu1 %vm386_vm1, %v2242_v36 }
 0xf00   : > { %2971 = vmatprep.mubr.msk.bf16.mxu1 %vm3270_vm2, %v3269_v38 }
 0xf6e   : > { %v2188_v37 = vpop.xlane.xlu0 %2187 }
 0xf6f   : > { %v2200_v51 = vmul.f32 0.03125, %v2188_v37 }
 0xf71   : > { %v2206_v56 = vadd.f32 1e-05, %v2200_v51 }
 0xf72   : > { %v2191_v15 = vpop.xlane.xlu1 %2190 }
 0xf73   : > { %3202 = vrsqrt.f32 %v2206_v56  ;;  %v2201_v5 = vmul.f32 0.03125, %v2191_v15 }
 0xf75   : > { %v2207_v11 = vadd.f32 1e-05, %v2201_v5 }
 0xf76   : > { %v2194_v41 = vpop.xlane.xlu0 %2193 }
 0xf77   : > { %3204 = vrsqrt.f32 %v2207_v11  ;;  %v2202_v59 = vmul.f32 0.03125, %v2194_v41 }
 0xf78   : > { %v2197_v20 = vpop.xlane.xlu1 %2196 }
 0xf79   : > { %v2208_v48 = vadd.f32 1e-05, %v2202_v59  ;;  %v2203_v7 = vmul.f32 0.03125, %v2197_v20 }
 0xf7b   : > { %3206 = vrsqrt.f32 %v2208_v48  ;;  %v2209_v22 = vadd.f32 1e-05, %v2203_v7 }
 0xf7d   : > { %v3203_v12 = vpop.eup %3202  ;;  %3208 = vrsqrt.f32 %v2209_v22 }
 0xf7e   : > { %v2218_v25 = vmul.f32 %v3203_v12, %v4033_v58 }
 0xf80   : > { %v2228_v19 = vmul.f32 %v2225_v49, %v2218_v25 }
 0xf81   : > { %v3205_v62 = vpop.eup %3204 }
 0xf82   : > { %v2219_v0 = vmul.f32 %v3205_v62, %v4038_v44  ;;  %v2238_v33 = vadd.f32 %v2235_v18, %v2228_v19 }
 0xf84   : > { %v2229_v31 = vmul.f32 %v2225_v49, %v2219_v0 }
 0xf85   : > { %v3207_v29 = vpop.eup %3206 }
 0xf86   : > { %v2220_v4 = vmul.f32 %v3207_v29, %v4044_v54  ;;  %v2239_v13 = vadd.f32 %v2235_v18, %v2229_v31  ;;  %v2251_v54 = vsub.s32 6, %v3421_v53 }
 0xf87   : > { %v3209_v34 = vpop.eup %3208 }
 0xf88   : > { %v2221_v23 = vmul.f32 %v3209_v34, %v4048_v14  ;;  %v2243_v26 = vpack.c.bf16 %v2239_v13, %v2238_v33  ;;  %v2230_v17 = vmul.f32 %v2225_v49, %v2220_v4  ;;  %v2252_v46 = vrot.slane %v3994_v57, %v2251_v54 }
 0xf8a   : > { %2972 = vmatmul.mubr.msk.bf16.gmra.mrb[52].mxu1 %vm386_vm1, %v2243_v26  ;;  %v2231_v21 = vmul.f32 %v2225_v49, %v2221_v23  ;;  %v2240_v44 = vadd.f32 %v2235_v18, %v2230_v17 }
 0xf8b   : > { %2975 = vmatprep.mubr.msk.bf16.mxu1 %vm3270_vm2, %v3269_v38 }
 0xf8c   : > { %v2241_v58 = vadd.f32 %v2235_v18, %v2231_v21 }
 0xf8e   : > { %v2244_v8 = vpack.c.bf16 %v2241_v58, %v2240_v44 }
 0xf92   : > { %2976 = vmatmul.mubr.msk.bf16.gmra.mrb[56].mxu1 %vm386_vm1, %v2244_v8 }
 0xfd2   : > { %v2308_v16 = vpop.f32.mrb[48].mxu1 }
 0xfd3   : > { %v2309_v28 = vadd.f32 %v2308_v16, %v2252_v46  ;;  %v2969_v14 = vpop.f32.mrb[49].mxu1 }
 0xfd4   : > { %v2311_v50 = vpop.f32.mrb[50].mxu1 }
 0xfd5   : > { %v2337_v24 = vmul.f32 0.044715, %v2309_v28  ;;  %v2312_v45 = vadd.f32 %v2311_v50, %v2252_v46  ;;  %v2970_v32 = vpop.f32.mrb[51].mxu1  ;;  %v2331_v2 = vmul.f32 0.5, %v2309_v28 }
 0xfd7   : > { %v2343_v49 = vmul.f32 %v2337_v24, %v2309_v28  ;;  %v2338_v52 = vmul.f32 0.044715, %v2312_v45  ;;  %v2332_v9 = vmul.f32 0.5, %v2312_v45 }
 0xfd9   : > { %v2349_v40 = vmul.f32 %v2343_v49, %v2309_v28  ;;  %v2344_v43 = vmul.f32 %v2338_v52, %v2312_v45 }
 0xfdb   : > { %v2355_v39 = vadd.f32 %v2349_v40, %v2309_v28  ;;  %v2350_v60 = vmul.f32 %v2344_v43, %v2312_v45 }
 0xfdd   : > { %v2361_v63 = vmul.f32 0.7978846, %v2355_v39  ;;  %v2356_v18 = vadd.f32 %v2350_v60, %v2312_v45 }
 0xfdf   : > { %3210 = vtanh.f32 %v2361_v63  ;;  %v2362_v30 = vmul.f32 0.7978846, %v2356_v18 }
 0xfe1   : > { %3212 = vtanh.f32 %v2362_v30 }
 0xfe9   : > { %v3211_v6 = vpop.eup %3210 }
 0xfea   : > { %v2373_v55 = vadd.f32 1.0, %v3211_v6 }
 0xfeb   : > { %v3213_v36 = vpop.eup %3212 }
 0xfec   : > { %v2374_v1 = vadd.f32 1.0, %v3213_v36  ;;  %v2379_v47 = vmul.f32 %v2373_v55, %v2331_v2 }
 0xfee   : > { %v2380_v37 = vmul.f32 %v2374_v1, %v2332_v9  ;;  %v2398_v9 = vsub.s32 5, %v3421_v53 }
 0xff0   : > { %v2385_v51 = vpack.c.bf16 %v2380_v37, %v2379_v47  ;;  %v2399_v1 = vrot.slane %v3994_v57, %v2398_v9 }
 0xff2   : > { %2988 = vmatmul.mubr.msk.bf16.vlgmr.msra.gmra.mrb[40].mxu0 %vm2424_vm10, %v2385_v51 }
 0xff3   : > { %2991 = vmatprep.mubr.msk.bf16.mxu0 %vm3270_vm2, %v3269_v38 }
0x105d   : > { %v2316_v56 = vpop.f32.mrb[52].mxu1 }
0x105e   : > { %v2317_v15 = vadd.f32 %v2316_v56, %v2252_v46  ;;  %v2973_v5 = vpop.f32.mrb[53].mxu1 }
0x105f   : > { %v2319_v11 = vpop.f32.mrb[54].mxu1 }
0x1060   : > { %v2339_v41 = vmul.f32 0.044715, %v2317_v15  ;;  %v2320_v59 = vadd.f32 %v2319_v11, %v2252_v46  ;;  %v2974_v20 = vpop.f32.mrb[55].mxu1  ;;  %v2333_v32 = vmul.f32 0.5, %v2317_v15 }
0x1062   : > { %v2345_v48 = vmul.f32 %v2339_v41, %v2317_v15  ;;  %v2340_v7 = vmul.f32 0.044715, %v2320_v59 }
0x1064   : > { %v2351_v22 = vmul.f32 %v2345_v48, %v2317_v15  ;;  %v2346_v12 = vmul.f32 %v2340_v7, %v2320_v59 }
0x1065   : > { %v2324_v25 = vpop.f32.mrb[56].mxu1 }
0x1066   : > { %v2357_v62 = vadd.f32 %v2351_v22, %v2317_v15  ;;  %v2352_v0 = vmul.f32 %v2346_v12, %v2320_v59  ;;  %v2325_v19 = vadd.f32 %v2324_v25, %v2252_v46  ;;  %v2977_v31 = vpop.f32.mrb[57].mxu1 }
0x1067   : > { %v2327_v29 = vpop.f32.mrb[58].mxu1 }
0x1068   : > { %v2363_v4 = vmul.f32 0.7978846, %v2357_v62  ;;  %v2358_v33 = vadd.f32 %v2352_v0, %v2320_v59  ;;  %v2341_v13 = vmul.f32 0.044715, %v2325_v19  ;;  %v2328_v34 = vadd.f32 %v2327_v29, %v2252_v46  ;;  %v2978_v23 = vpop.f32.mrb[59].mxu1 }
0x1069   : > { %v2334_v46 = vmul.f32 0.5, %v2320_v59  ;;  %v2335_v18 = vmul.f32 0.5, %v2325_v19 }
0x106a   : > { %3214 = vtanh.f32 %v2363_v4  ;;  %v2364_v26 = vmul.f32 0.7978846, %v2358_v33  ;;  %v2347_v17 = vmul.f32 %v2341_v13, %v2325_v19  ;;  %v2342_v21 = vmul.f32 0.044715, %v2328_v34 }
0x106b   : > { %v2336_v30 = vmul.f32 0.5, %v2328_v34 }
0x106c   : > { %3216 = vtanh.f32 %v2364_v26  ;;  %v2353_v58 = vmul.f32 %v2347_v17, %v2325_v19  ;;  %v2348_v44 = vmul.f32 %v2342_v21, %v2328_v34 }
0x106e   : > { %v2359_v8 = vadd.f32 %v2353_v58, %v2325_v19  ;;  %v2354_v54 = vmul.f32 %v2348_v44, %v2328_v34 }
0x1070   : > { %v2365_v16 = vmul.f32 0.7978846, %v2359_v8  ;;  %v2360_v28 = vadd.f32 %v2354_v54, %v2328_v34 }
0x1072   : > { %3218 = vtanh.f32 %v2365_v16  ;;  %v2366_v14 = vmul.f32 0.7978846, %v2360_v28 }
0x1074   : > { %v3215_v50 = vpop.eup %3214  ;;  %3220 = vtanh.f32 %v2366_v14 }
0x1075   : > { %v2375_v24 = vadd.f32 1.0, %v3215_v50 }
0x1076   : > { %v3217_v45 = vpop.eup %3216 }
0x1077   : > { %v2376_v49 = vadd.f32 1.0, %v3217_v45  ;;  %v2381_v52 = vmul.f32 %v2375_v24, %v2333_v32 }
0x1079   : > { %v2382_v40 = vmul.f32 %v2376_v49, %v2334_v46 }
0x107b   : > { %v2386_v43 = vpack.c.bf16 %v2382_v40, %v2381_v52 }
0x107c   : > { %v3219_v39 = vpop.eup %3218 }
0x107d   : > { %2992 = vmatmul.mubr.msk.bf16.gmra.mrb[44].mxu0 %vm2424_vm10, %v2386_v43  ;;  %v2377_v60 = vadd.f32 1.0, %v3219_v39 }
0x107e   : > { %v3221_v63 = vpop.eup %3220  ;;  %2995 = vmatprep.mubr.msk.bf16.mxu0 %vm3270_vm2, %v3269_v38 }
0x107f   : > { %v2378_v6 = vadd.f32 1.0, %v3221_v63  ;;  %v2383_v55 = vmul.f32 %v2377_v60, %v2335_v18 }
0x1081   : > { %v2384_v36 = vmul.f32 %v2378_v6, %v2336_v30 }
0x1083   : > { %v2387_v2 = vpack.c.bf16 %v2384_v36, %v2383_v55 }
0x1085   : > { %2996 = vmatmul.mubr.msk.bf16.gmra.mrb[48].mxu0 %vm2424_vm10, %v2387_v2 }
0x10c5   : > { %v2468_v47 = vpop.f32.mrb[40].mxu0 }
0x10c6   : > { %v2469_v37 = vadd.f32 %v2468_v47, %v2399_v1  ;;  %v2989_v51 = vpop.f32.mrb[41].mxu0 }
0x10c7   : > { %v2471_v56 = vpop.f32.mrb[42].mxu0 }
0x10c8   : > { %v2491_v15 = vadd.f32 %v2469_v37, %v3997_v35  ;;  %v2472_v5 = vadd.f32 %v2471_v56, %v2399_v1  ;;  %v2990_v38 = vpop.f32.mrb[43].mxu0 }
0x10ca   : > { %2497 = vst.msk [vmem:[#allocation2] sm:$0xff] %vm386_vm1, %v2491_v15  ;;  %v2492_v11 = vadd.f32 %v2472_v5, %v3999_v27  ;;  %2507 = vst.msk [vmem:[%s3385_s15] sm:$0xff] (!%p2710_p8), %vm386_vm1, %v2491_v15 }
0x10cc   : > { %2498 = vst.msk [vmem:[#allocation2 + $0x8] sm:$0xff] %vm386_vm1, %v2492_v11  ;;  %2508 = vst.msk [vmem:[%s3385_s15 + $0x8] sm:$0xff] (!%p2710_p8), %vm386_vm1, %v2492_v11 }
0x1150   : > { %v2476_v41 = vpop.f32.mrb[44].mxu0 }
0x1151   : > { %v2477_v59 = vadd.f32 %v2476_v41, %v2399_v1  ;;  %v2993_v20 = vpop.f32.mrb[45].mxu0 }
0x1152   : > { %v2479_v53 = vpop.f32.mrb[46].mxu0 }
0x1153   : > { %v2493_v57 = vadd.f32 %v2477_v59, %v4005_v61  ;;  %v2480_v48 = vadd.f32 %v2479_v53, %v2399_v1  ;;  %v2994_v7 = vpop.f32.mrb[47].mxu0 }
0x1155   : > { %2499 = vst.msk [vmem:[#allocation2 + $0x10] sm:$0xff] %vm386_vm1, %v2493_v57  ;;  %v2494_v35 = vadd.f32 %v2480_v48, %v4007_v42  ;;  %2509 = vst.msk [vmem:[%s3385_s15 + $0x10] sm:$0xff] (!%p2710_p8), %vm386_vm1, %v2493_v57 }
0x1157   : > { %2500 = vst.msk [vmem:[#allocation2 + $0x18] sm:$0xff] %vm386_vm1, %v2494_v35  ;;  %2510 = vst.msk [vmem:[%s3385_s15 + $0x18] sm:$0xff] (!%p2710_p8), %vm386_vm1, %v2494_v35 }
0x1158   : > { %v2484_v22 = vpop.f32.mrb[48].mxu0 }
0x1159   : > { %v2485_v12 = vadd.f32 %v2484_v22, %v2399_v1  ;;  %v2997_v25 = vpop.f32.mrb[49].mxu0  ;;  %2506 = sbr.rel (%p2710_p8) target bundleno = 4448 (0x1160), region = 52 }
0x115a   : > { %v2487_v27 = vpop.f32.mrb[50].mxu0 }
0x115b   : > { %v2495_v62 = vadd.f32 %v2485_v12, %v4017_v3  ;;  %v2488_v0 = vadd.f32 %v2487_v27, %v2399_v1  ;;  %v2998_v19 = vpop.f32.mrb[51].mxu0 }
0x115d   : > { %2501 = vst.msk [vmem:[#allocation2 + $0x20] sm:$0xff] %vm386_vm1, %v2495_v62  ;;  %v2496_v61 = vadd.f32 %v2488_v0, %v4019_v10  ;;  %2511 = vst.msk [vmem:[%s3385_s15 + $0x20] sm:$0xff] (!%p2710_p8), %vm386_vm1, %v2495_v62 }
0x115f   : > { %2502 = vst.msk [vmem:[#allocation2 + $0x28] sm:$0xff] %vm386_vm1, %v2496_v61  ;;  %2512 = vst.msk [vmem:[%s3385_s15 + $0x28] sm:$0xff] (!%p2710_p8), %vm386_vm1, %v2496_v61 }
0x1160 PF: > { %s16_s25 = sadd.s32 1, %s3267_s25   ;;  %s4139_s21 = smov %s3259_s23 }
0x1161   : > { %p13_p9 = scmp.ge.s32.totalorder %s16_s25, 6   ;;  %s4140_s22 = smov %s3263_s24 }
0x1162   : > { %s4141_s23 = smov %s4144_s26  ;;  %s4142_s24 = smov %s4148_s27 }
0x1163   :  { %15 = sbr.rel (!%p13_p9) target bundleno = 3 (0x3), region = 97 }

</bundles_post_ra>
